<compile_context>
chip_gen: v7x
topology: tpu7x:2x2x1
jax: 0.10.0
libtpu: 0.0.40
codegen_flags: <defaults>
</compile_context>

<pallas_src>
import functools

import jax
import jax.numpy as jnp
from jax.experimental import pallas as pl
from jax.experimental.pallas import tpu as pltpu

VMEM_SPEC = pl.BlockSpec(memory_space=pltpu.MemorySpace.VMEM)


# ------------------------- single fused forward kernel -------------------------
def _fused_forward_kernel(tok_ref, emb_ref, winf_ref, winb_ref, whh_ref, bg_ref,
                          posw_ref, posb_ref, fcwh_ref, fcwp_ref, fcb_ref,
                          mw_ref, mb_ref, o_ref, *, K, B, H, NPOS):
    # tok_ref : (2*K*B, 1) int32; rows [0:KB] time-major fwd order (row = t*B+b),
    #           rows [KB:2KB] time-reversed order (row t holds token at K-1-t).
    # emb_ref : (V, 2E)   bf16, columns [main embedding | pos embedding]
    # winf_ref: (2E, 16H) bf16, fwd-direction input proj (gate-major cols, bwd cols 0)
    # winb_ref: (2E, 16H) bf16, bwd-direction input proj (fwd cols 0)
    # whh_ref : (4H, 16H) bf16, block-diag recurrent proj over [mf|pf|mb|pb] state
    # bg_ref  : (1, 16H)  f32, combined b_ih + b_hh, gate-major
    # o_ref   : (K*B, 128) f32, lane-padded morph logits (time-major rows)
    V = emb_ref.shape[0]
    KB = K * B
    H2, H4 = 2 * H, 4 * H                 # H4 = width of one gate group = state width

    # ---- embedding lookup (one-hot matmul) for fwd + reversed token orders ----
    tok = tok_ref[...]                                                   # (2KB, 1)
    onehot = (tok == jax.lax.broadcasted_iota(jnp.int32, (2 * KB, V), 1)
              ).astype(jnp.bfloat16)                                     # (2KB, V)
    emb = jnp.maximum(jnp.dot(onehot, emb_ref[...],
                              preferred_element_type=jnp.float32), 0.0)  # relu(emb)
    emb = emb.astype(jnp.bfloat16)                                       # (2KB, 2E)
    emb_f = emb[0:KB]                     # [main(t)   | pos(t)  ]
    emb_b = emb[KB:2 * KB]                # [main(K-1-t)| pos(K-1-t)]

    # ---- input projection for all 4 (branch, direction) blocks, hoisted ----
    z = (jnp.dot(emb_f, winf_ref[...], preferred_element_type=jnp.float32)
         + jnp.dot(emb_b, winb_ref[...], preferred_element_type=jnp.float32)
         + bg_ref[...])                                                  # (KB, 16H)

    whh = whh_ref[...]                                                   # (4H, 16H)

    # ---- fully unrolled recurrence: ONE (B,4H)x(4H,16H) MXU matmul per step ----
    h = jnp.zeros((B, H4), jnp.float32)   # state columns: [main_f | pos_f | main_b | pos_b]
    c = jnp.zeros((B, H4), jnp.float32)
    hs = []
    for t in range(K):
        gates = z[t * B:(t + 1) * B]
        if t > 0:
            gates = gates + jnp.dot(h.astype(jnp.bfloat16), whh,
                                    preferred_element_type=jnp.float32)  # (B, 16H)
        i_g = jax.nn.sigmoid(gates[:, 0 * H4:1 * H4])    # full-vreg slices (128 lanes)
        f_g = jax.nn.sigmoid(gates[:, 1 * H4:2 * H4])
        g_g = jnp.tanh(gates[:, 2 * H4:3 * H4])
        o_g = jax.nn.sigmoid(gates[:, 3 * H4:4 * H4])
        c = f_g * c + i_g * g_g
        h = o_g * jnp.tanh(c)
        hs.append(h)

    # ---- realign backward direction in time; build (KB, 4H) hidden, time-major ----
    # fwd halves come from step k, bwd halves from step K-1-k (done once, off the
    # recurrence critical path; replaces 16 per-step masked strided stores).
    hid = jnp.concatenate(
        [jnp.concatenate([hs[k][:, 0:H2], hs[K - 1 - k][:, H2:H4]], axis=-1)
         for k in range(K)], axis=0)                                     # (KB, 4H)
    hid = jnp.maximum(hid, 0.0)           # relu for fc() and for the pos head
    hid_bf = hid.astype(jnp.bfloat16)

    # ---- frozen pos head: linear(19) -> softmax -> (> 1/19), division-free ----
    # TODO(synk): frozen pos_model checkpoint unavailable; this head's structure is
    # inferred and its weights are synthetic (main-branch rows are zeroed in posw).
    pos_logits = (jnp.dot(hid_bf, posw_ref[...],
                          preferred_element_type=jnp.float32) + posb_ref[...])
    e = jnp.exp(pos_logits - jnp.max(pos_logits, axis=-1, keepdims=True))
    pos_bin = (e * float(NPOS) > jnp.sum(e, axis=-1, keepdims=True)
               ).astype(jnp.bfloat16)                                    # (KB, 19)

    # ---- fc: dropout(id) -> relu -> Linear; concat folded into split matmul ----
    x_fc = (jnp.dot(hid_bf, fcwh_ref[...], preferred_element_type=jnp.float32)
            + jnp.dot(pos_bin, fcwp_ref[...], preferred_element_type=jnp.float32)
            + fcb_ref[...])

    # ---- dropout(id) -> relu -> stacked morph heads (lane-padded to 128 cols) ----
    x_fc = jnp.maximum(x_fc, 0.0).astype(jnp.bfloat16)
    o_ref[...] = (jnp.dot(x_fc, mw_ref[...], preferred_element_type=jnp.float32)
                  + mb_ref[...])


def fused_forward(tok, p, *, B, K, H):
    kernel = functools.partial(_fused_forward_kernel, K=K, B=B, H=H,
                               NPOS=p['pos_b'].shape[1])
    args = (tok, p['emb'], p['w_in_f'], p['w_in_b'], p['w_hh'], p['b_gate'],
            p['pos_w'], p['pos_b'], p['fc_w_h'], p['fc_w_p'], p['fc_b'],
            p['morph_w'], p['morph_b'])
    return pl.pallas_call(
        kernel,
        out_shape=jax.ShapeDtypeStruct((K * B, 128), jnp.float32),
        in_specs=[VMEM_SPEC] * len(args),
        out_specs=VMEM_SPEC,
    )(*args)


# -------------------------------- parameters ----------------------------------
def init_params(key, num_words, emb_size, hidden, num_classes, max_poss,
                fc_hidden, num_pos=19):
    # TODO(synk): the frozen pos_model (LSTMClassifier) checkpoint/config are not
    # available; its structure is inferred and its weights are synthetic, with its
    # hidden size padded to `hidden` so both branches share one fused recurrence.
    H, E, FC = hidden, emb_size, fc_hidden
    keys = iter(jax.random.split(key, 32))

    def nrm(shape, scale=0.1):
        return scale * jax.random.normal(next(keys), shape, dtype=jnp.float32)

    # per (branch, direction) LSTM weights in PyTorch gate order [i|f|g|o]
    # block order: 0=main_fwd, 1=pos_fwd, 2=main_bwd, 3=pos_bwd
    blocks = [(nrm((E, 4 * H)), nrm((H, 4 * H)), nrm((1, 4 * H)))   # w_ih^T, w_hh^T, b_ih+b_hh
              for _ in range(4)]

    def gate_major(cols_per_block):
        # cols_per_block[k]: (R, 4H) with columns [i|f|g|o] for block k.
        # Returns (R, 16H): columns grouped by gate, then by block -> every gate
        # group is 4H = 128 lanes wide (full-vreg slices in the kernel).
        out = []
        for g in range(4):
            for k in range(4):
                out.append(cols_per_block[k][:, g * H:(g + 1) * H])
        return jnp.concatenate(out, axis=1)

    zE = jnp.zeros((E, 4 * H), jnp.float32)
    z2E = jnp.zeros((2 * E, 4 * H), jnp.float32)
    zH = jnp.zeros((H, 4 * H), jnp.float32)

    # forward-direction input projection: emb rows = [main emb (E) | pos emb (E)]
    w_in_f = gate_major([
        jnp.concatenate([blocks[0][0], zE], axis=0),    # main_fwd <- main embedding
        jnp.concatenate([zE, blocks[1][0]], axis=0),    # pos_fwd  <- pos embedding
        z2E, z2E])                                      # bwd columns zero
    # backward-direction input projection (fed with time-reversed embeddings)
    w_in_b = gate_major([
        z2E, z2E,
        jnp.concatenate([blocks[2][0], zE], axis=0),    # main_bwd
        jnp.concatenate([zE, blocks[3][0]], axis=0)])   # pos_bwd

    # block-diagonal recurrent projection over state columns [mf | pf | mb | pb]
    def place_rows(mat, k):
        return jnp.concatenate([mat if j == k else zH for j in range(4)], axis=0)
    w_hh = gate_major([place_rows(blocks[k][1], k) for k in range(4)])   # (4H, 16H)

    b_gate = gate_major([blocks[k][2] for k in range(4)])                # (1, 16H)

    # embedding tables, columns [main | pos]
    emb_both = jnp.concatenate([nrm((num_words, E)), nrm((num_words, E))], axis=1)

    # frozen pos head: rows placed at the pos-branch state slots, main rows zero
    pos_w = nrm((2 * H, num_pos))
    zHp = jnp.zeros((H, num_pos), jnp.float32)
    pos_w_full = jnp.concatenate([zHp, pos_w[:H], zHp, pos_w[H:]], axis=0)   # (4H, 19)

    # fc Linear(2H+19 -> FC); lstm-output rows placed at the main-branch state slots
    fc_w = nrm((2 * H + num_pos, FC))
    zHf = jnp.zeros((H, FC), jnp.float32)
    fc_w_h_full = jnp.concatenate([fc_w[:H], zHf, fc_w[H:2 * H], zHf], axis=0)  # (4H, FC)
    fc_w_p = fc_w[2 * H:]                                                        # (19, FC)

    # num_classes morph heads stacked (add_zero=False -> all heads output max_poss),
    # lane-padded to 128 output columns so the final store is unmasked.
    CP = num_classes * max_poss
    morph_w = jnp.pad(nrm((FC, CP)), ((0, 0), (0, 128 - CP)))
    morph_b = jnp.pad(nrm((1, CP)), ((0, 0), (0, 128 - CP)))

    bf = lambda x: x.astype(jnp.bfloat16)       # MXU operands in bf16
    return {
        'emb': bf(emb_both),
        'w_in_f': bf(w_in_f), 'w_in_b': bf(w_in_b), 'w_hh': bf(w_hh),
        'b_gate': b_gate,
        'pos_w': bf(pos_w_full), 'pos_b': nrm((1, num_pos)),
        'fc_w_h': bf(fc_w_h_full), 'fc_w_p': bf(fc_w_p), 'fc_b': nrm((1, FC)),
        'morph_w': bf(morph_w), 'morph_b': morph_b,
    }


# -------------------------------- full forward --------------------------------
def morph_pos_forward(tokens, params, num_classes, max_poss):
    B, K = tokens.shape
    H = params['w_hh'].shape[0] // 4

    # tiny XLA glue: time-major fwd order + time-reversed order token columns
    tok_fwd = tokens.T.reshape(K * B, 1)
    tok_bwd = tokens[:, ::-1].T.reshape(K * B, 1)
    tok = jnp.concatenate([tok_fwd, tok_bwd], axis=0).astype(jnp.int32)

    out = fused_forward(tok, params, B=B, K=K, H=H)          # (K*B, 128), one kernel
    CP = num_classes * max_poss
    logits = out[:, :CP].reshape(K, B, num_classes, max_poss)
    return jnp.transpose(logits, (1, 0, 2, 3))               # (B, K, C, P)


# ------------------------------------ main -------------------------------------
if __name__ == "__main__":
    B, K = 2, 8
    NUM_WORDS = 50
    EMB = 16
    H1 = 32                    # lstm_hidd_size_1 (bidirectional -> 64 features)
    FC_HIDDEN = 32             # fc_hidd_size = [32]
    NUM_CLASSES = 5            # morph categories
    NUM_C_POSSIBILITY = [3, 4, 2, 5, 3]
    MAX_POSS = max(NUM_C_POSSIBILITY)   # add_zero=False -> all heads output MAX_POSS

    key = jax.random.PRNGKey(0)
    k_tok, k_par = jax.random.split(key)
    tokens = jax.random.randint(k_tok, (B, K), 0, NUM_WORDS, dtype=jnp.int32)
    params = init_params(k_par, NUM_WORDS, EMB, H1, NUM_CLASSES, MAX_POSS, FC_HIDDEN)

    out = morph_pos_forward(tokens, params, NUM_CLASSES, MAX_POSS)
    out = jax.block_until_ready(out)
    assert out.shape == (B, K, NUM_CLASSES, MAX_POSS), out.shape
    assert out.dtype == jnp.float32
    print("KERNEL_OK")
</pallas_src>

<mosaic_0001>
module attributes {stable_mosaic.version = 11 : i64} {
  func.func @_fused_forward_kernel(%arg0: memref<32x1xi32, #tpu.memory_space<vmem>>, %arg1: memref<50x32xbf16, #tpu.memory_space<vmem>>, %arg2: memref<32x512xbf16, #tpu.memory_space<vmem>>, %arg3: memref<32x512xbf16, #tpu.memory_space<vmem>>, %arg4: memref<128x512xbf16, #tpu.memory_space<vmem>>, %arg5: memref<1x512xf32, #tpu.memory_space<vmem>>, %arg6: memref<128x19xbf16, #tpu.memory_space<vmem>>, %arg7: memref<1x19xf32, #tpu.memory_space<vmem>>, %arg8: memref<128x32xbf16, #tpu.memory_space<vmem>>, %arg9: memref<19x32xbf16, #tpu.memory_space<vmem>>, %arg10: memref<1x32xf32, #tpu.memory_space<vmem>>, %arg11: memref<32x128xbf16, #tpu.memory_space<vmem>>, %arg12: memref<1x128xf32, #tpu.memory_space<vmem>>, %arg13: memref<16x128xf32, #tpu.memory_space<vmem>>) attributes {dimension_semantics = [], scalar_prefetch = 0 : i64, scratch_operands = 0 : i64, tpu.core_type = #tpu.core_type<tc>} {
    %c0 = arith.constant 0 : index
    %c0_0 = arith.constant 0 : index
    %0 = vector.load %arg0[%c0, %c0_0] : memref<32x1xi32, #tpu.memory_space<vmem>>, vector<32x1xi32>
    %1 = tpu.iota {dimensions = array<i32: 1>} : vector<32x50xi32>
    %2 = vector.broadcast %0 : vector<32x1xi32> to vector<32x50xi32>
    %3 = arith.cmpi eq, %2, %1 : vector<32x50xi32>
    %4 = arith.extui %3 : vector<32x50xi1> to vector<32x50xi32>
    %5 = arith.sitofp %4 : vector<32x50xi32> to vector<32x50xf32>
    %6 = arith.truncf %5 : vector<32x50xf32> to vector<32x50xbf16>
    %c0_1 = arith.constant 0 : index
    %c0_2 = arith.constant 0 : index
    %7 = vector.load %arg1[%c0_1, %c0_2] : memref<50x32xbf16, #tpu.memory_space<vmem>>, vector<50x32xbf16>
    %cst = arith.constant dense<0.000000e+00> : vector<32x32xf32>
    %8 = tpu.matmul %6, %7, %cst {dimension_numbers = #tpu.dot_dimension_numbers<[1], [0], [0], [1], [0, 0, 1, 1], [], []>} : vector<32x50xbf16>, vector<50x32xbf16>, vector<32x32xf32> -> vector<32x32xf32>
    %cst_3 = arith.constant 0.000000e+00 : f32
    %9 = vector.broadcast %cst_3 : f32 to vector<32x32xf32>
    %10 = arith.maximumf %8, %9 : vector<32x32xf32>
    %11 = arith.truncf %10 : vector<32x32xf32> to vector<32x32xbf16>
    %12 = vector.extract_strided_slice %11 {offsets = [0, 0], sizes = [16, 32], strides = [1, 1]} : vector<32x32xbf16> to vector<16x32xbf16>
    %13 = vector.extract_strided_slice %11 {offsets = [16, 0], sizes = [16, 32], strides = [1, 1]} : vector<32x32xbf16> to vector<16x32xbf16>
    %c0_4 = arith.constant 0 : index
    %c0_5 = arith.constant 0 : index
    %14 = vector.load %arg2[%c0_4, %c0_5] : memref<32x512xbf16, #tpu.memory_space<vmem>>, vector<32x512xbf16>
    %cst_6 = arith.constant dense<0.000000e+00> : vector<16x512xf32>
    %15 = tpu.matmul %12, %14, %cst_6 {dimension_numbers = #tpu.dot_dimension_numbers<[1], [0], [0], [1], [0, 0, 1, 1], [], []>} : vector<16x32xbf16>, vector<32x512xbf16>, vector<16x512xf32> -> vector<16x512xf32>
    %c0_7 = arith.constant 0 : index
    %c0_8 = arith.constant 0 : index
    %16 = vector.load %arg3[%c0_7, %c0_8] : memref<32x512xbf16, #tpu.memory_space<vmem>>, vector<32x512xbf16>
    %cst_9 = arith.constant dense<0.000000e+00> : vector<16x512xf32>
    %17 = tpu.matmul %13, %16, %cst_9 {dimension_numbers = #tpu.dot_dimension_numbers<[1], [0], [0], [1], [0, 0, 1, 1], [], []>} : vector<16x32xbf16>, vector<32x512xbf16>, vector<16x512xf32> -> vector<16x512xf32>
    %18 = arith.addf %15, %17 : vector<16x512xf32>
    %c0_10 = arith.constant 0 : index
    %c0_11 = arith.constant 0 : index
    %19 = vector.load %arg5[%c0_10, %c0_11] : memref<1x512xf32, #tpu.memory_space<vmem>>, vector<1x512xf32>
    %20 = vector.broadcast %19 : vector<1x512xf32> to vector<16x512xf32>
    %21 = arith.addf %18, %20 : vector<16x512xf32>
    %c0_12 = arith.constant 0 : index
    %c0_13 = arith.constant 0 : index
    %22 = vector.load %arg4[%c0_12, %c0_13] : memref<128x512xbf16, #tpu.memory_space<vmem>>, vector<128x512xbf16>
    %cst_14 = arith.constant 0.000000e+00 : f32
    %23 = vector.broadcast %cst_14 : f32 to vector<2x128xf32>
    %24 = vector.extract_strided_slice %21 {offsets = [0, 0], sizes = [2, 512], strides = [1, 1]} : vector<16x512xf32> to vector<2x512xf32>
    %25 = vector.extract_strided_slice %24 {offsets = [0, 0], sizes = [2, 128], strides = [1, 1]} : vector<2x512xf32> to vector<2x128xf32>
    %26 = arith.negf %25 : vector<2x128xf32>
    %27 = math.exp %26 : vector<2x128xf32>
    %cst_15 = arith.constant 1.000000e+00 : f32
    %28 = vector.broadcast %cst_15 : f32 to vector<2x128xf32>
    %29 = arith.addf %28, %27 : vector<2x128xf32>
    %30 = arith.divf %28, %29 : vector<2x128xf32>
    %31 = vector.extract_strided_slice %24 {offsets = [0, 128], sizes = [2, 128], strides = [1, 1]} : vector<2x512xf32> to vector<2x128xf32>
    %32 = arith.negf %31 : vector<2x128xf32>
    %33 = math.exp %32 : vector<2x128xf32>
    %cst_16 = arith.constant 1.000000e+00 : f32
    %34 = vector.broadcast %cst_16 : f32 to vector<2x128xf32>
    %35 = arith.addf %34, %33 : vector<2x128xf32>
    %36 = arith.divf %34, %35 : vector<2x128xf32>
    %37 = vector.extract_strided_slice %24 {offsets = [0, 256], sizes = [2, 128], strides = [1, 1]} : vector<2x512xf32> to vector<2x128xf32>
    %38 = math.tanh %37 : vector<2x128xf32>
    %39 = vector.extract_strided_slice %24 {offsets = [0, 384], sizes = [2, 128], strides = [1, 1]} : vector<2x512xf32> to vector<2x128xf32>
    %40 = arith.negf %39 : vector<2x128xf32>
    %41 = math.exp %40 : vector<2x128xf32>
    %cst_17 = arith.constant 1.000000e+00 : f32
    %42 = vector.broadcast %cst_17 : f32 to vector<2x128xf32>
    %43 = arith.addf %42, %41 : vector<2x128xf32>
    %44 = arith.divf %42, %43 : vector<2x128xf32>
    %45 = arith.mulf %36, %23 : vector<2x128xf32>
    %46 = arith.mulf %30, %38 : vector<2x128xf32>
    %47 = arith.addf %45, %46 : vector<2x128xf32>
    %48 = math.tanh %47 : vector<2x128xf32>
    %49 = arith.mulf %44, %48 : vector<2x128xf32>
    %50 = vector.extract_strided_slice %21 {offsets = [2, 0], sizes = [2, 512], strides = [1, 1]} : vector<16x512xf32> to vector<2x512xf32>
    %51 = arith.truncf %49 : vector<2x128xf32> to vector<2x128xbf16>
    %cst_18 = arith.constant dense<0.000000e+00> : vector<2x512xf32>
    %52 = tpu.matmul %51, %22, %cst_18 {dimension_numbers = #tpu.dot_dimension_numbers<[1], [0], [0], [1], [0, 0, 1, 1], [], []>} : vector<2x128xbf16>, vector<128x512xbf16>, vector<2x512xf32> -> vector<2x512xf32>
    %53 = arith.addf %50, %52 : vector<2x512xf32>
    %54 = vector.extract_strided_slice %53 {offsets = [0, 0], sizes = [2, 128], strides = [1, 1]} : vector<2x512xf32> to vector<2x128xf32>
    %55 = arith.negf %54 : vector<2x128xf32>
    %56 = math.exp %55 : vector<2x128xf32>
    %cst_19 = arith.constant 1.000000e+00 : f32
    %57 = vector.broadcast %cst_19 : f32 to vector<2x128xf32>
    %58 = arith.addf %57, %56 : vector<2x128xf32>
    %59 = arith.divf %57, %58 : vector<2x128xf32>
    %60 = vector.extract_strided_slice %53 {offsets = [0, 128], sizes = [2, 128], strides = [1, 1]} : vector<2x512xf32> to vector<2x128xf32>
    %61 = arith.negf %60 : vector<2x128xf32>
    %62 = math.exp %61 : vector<2x128xf32>
    %cst_20 = arith.constant 1.000000e+00 : f32
    %63 = vector.broadcast %cst_20 : f32 to vector<2x128xf32>
    %64 = arith.addf %63, %62 : vector<2x128xf32>
    %65 = arith.divf %63, %64 : vector<2x128xf32>
    %66 = vector.extract_strided_slice %53 {offsets = [0, 256], sizes = [2, 128], strides = [1, 1]} : vector<2x512xf32> to vector<2x128xf32>
    %67 = math.tanh %66 : vector<2x128xf32>
    %68 = vector.extract_strided_slice %53 {offsets = [0, 384], sizes = [2, 128], strides = [1, 1]} : vector<2x512xf32> to vector<2x128xf32>
    %69 = arith.negf %68 : vector<2x128xf32>
    %70 = math.exp %69 : vector<2x128xf32>
    %cst_21 = arith.constant 1.000000e+00 : f32
    %71 = vector.broadcast %cst_21 : f32 to vector<2x128xf32>
    %72 = arith.addf %71, %70 : vector<2x128xf32>
    %73 = arith.divf %71, %72 : vector<2x128xf32>
    %74 = arith.mulf %65, %47 : vector<2x128xf32>
    %75 = arith.mulf %59, %67 : vector<2x128xf32>
    %76 = arith.addf %74, %75 : vector<2x128xf32>
    %77 = math.tanh %76 : vector<2x128xf32>
    %78 = arith.mulf %73, %77 : vector<2x128xf32>
    %79 = vector.extract_strided_slice %21 {offsets = [4, 0], sizes = [2, 512], strides = [1, 1]} : vector<16x512xf32> to vector<2x512xf32>
    %80 = arith.truncf %78 : vector<2x128xf32> to vector<2x128xbf16>
    %cst_22 = arith.constant dense<0.000000e+00> : vector<2x512xf32>
    %81 = tpu.matmul %80, %22, %cst_22 {dimension_numbers = #tpu.dot_dimension_numbers<[1], [0], [0], [1], [0, 0, 1, 1], [], []>} : vector<2x128xbf16>, vector<128x512xbf16>, vector<2x512xf32> -> vector<2x512xf32>
    %82 = arith.addf %79, %81 : vector<2x512xf32>
    %83 = vector.extract_strided_slice %82 {offsets = [0, 0], sizes = [2, 128], strides = [1, 1]} : vector<2x512xf32> to vector<2x128xf32>
    %84 = arith.negf %83 : vector<2x128xf32>
    %85 = math.exp %84 : vector<2x128xf32>
    %cst_23 = arith.constant 1.000000e+00 : f32
    %86 = vector.broadcast %cst_23 : f32 to vector<2x128xf32>
    %87 = arith.addf %86, %85 : vector<2x128xf32>
    %88 = arith.divf %86, %87 : vector<2x128xf32>
    %89 = vector.extract_strided_slice %82 {offsets = [0, 128], sizes = [2, 128], strides = [1, 1]} : vector<2x512xf32> to vector<2x128xf32>
    %90 = arith.negf %89 : vector<2x128xf32>
    %91 = math.exp %90 : vector<2x128xf32>
    %cst_24 = arith.constant 1.000000e+00 : f32
    %92 = vector.broadcast %cst_24 : f32 to vector<2x128xf32>
    %93 = arith.addf %92, %91 : vector<2x128xf32>
    %94 = arith.divf %92, %93 : vector<2x128xf32>
    %95 = vector.extract_strided_slice %82 {offsets = [0, 256], sizes = [2, 128], strides = [1, 1]} : vector<2x512xf32> to vector<2x128xf32>
    %96 = math.tanh %95 : vector<2x128xf32>
    %97 = vector.extract_strided_slice %82 {offsets = [0, 384], sizes = [2, 128], strides = [1, 1]} : vector<2x512xf32> to vector<2x128xf32>
    %98 = arith.negf %97 : vector<2x128xf32>
    %99 = math.exp %98 : vector<2x128xf32>
    %cst_25 = arith.constant 1.000000e+00 : f32
    %100 = vector.broadcast %cst_25 : f32 to vector<2x128xf32>
    %101 = arith.addf %100, %99 : vector<2x128xf32>
    %102 = arith.divf %100, %101 : vector<2x128xf32>
    %103 = arith.mulf %94, %76 : vector<2x128xf32>
    %104 = arith.mulf %88, %96 : vector<2x128xf32>
    %105 = arith.addf %103, %104 : vector<2x128xf32>
    %106 = math.tanh %105 : vector<2x128xf32>
    %107 = arith.mulf %102, %106 : vector<2x128xf32>
    %108 = vector.extract_strided_slice %21 {offsets = [6, 0], sizes = [2, 512], strides = [1, 1]} : vector<16x512xf32> to vector<2x512xf32>
    %109 = arith.truncf %107 : vector<2x128xf32> to vector<2x128xbf16>
    %cst_26 = arith.constant dense<0.000000e+00> : vector<2x512xf32>
    %110 = tpu.matmul %109, %22, %cst_26 {dimension_numbers = #tpu.dot_dimension_numbers<[1], [0], [0], [1], [0, 0, 1, 1], [], []>} : vector<2x128xbf16>, vector<128x512xbf16>, vector<2x512xf32> -> vector<2x512xf32>
    %111 = arith.addf %108, %110 : vector<2x512xf32>
    %112 = vector.extract_strided_slice %111 {offsets = [0, 0], sizes = [2, 128], strides = [1, 1]} : vector<2x512xf32> to vector<2x128xf32>
    %113 = arith.negf %112 : vector<2x128xf32>
    %114 = math.exp %113 : vector<2x128xf32>
    %cst_27 = arith.constant 1.000000e+00 : f32
    %115 = vector.broadcast %cst_27 : f32 to vector<2x128xf32>
    %116 = arith.addf %115, %114 : vector<2x128xf32>
    %117 = arith.divf %115, %116 : vector<2x128xf32>
    %118 = vector.extract_strided_slice %111 {offsets = [0, 128], sizes = [2, 128], strides = [1, 1]} : vector<2x512xf32> to vector<2x128xf32>
    %119 = arith.negf %118 : vector<2x128xf32>
    %120 = math.exp %119 : vector<2x128xf32>
    %cst_28 = arith.constant 1.000000e+00 : f32
    %121 = vector.broadcast %cst_28 : f32 to vector<2x128xf32>
    %122 = arith.addf %121, %120 : vector<2x128xf32>
    %123 = arith.divf %121, %122 : vector<2x128xf32>
    %124 = vector.extract_strided_slice %111 {offsets = [0, 256], sizes = [2, 128], strides = [1, 1]} : vector<2x512xf32> to vector<2x128xf32>
    %125 = math.tanh %124 : vector<2x128xf32>
    %126 = vector.extract_strided_slice %111 {offsets = [0, 384], sizes = [2, 128], strides = [1, 1]} : vector<2x512xf32> to vector<2x128xf32>
    %127 = arith.negf %126 : vector<2x128xf32>
    %128 = math.exp %127 : vector<2x128xf32>
    %cst_29 = arith.constant 1.000000e+00 : f32
    %129 = vector.broadcast %cst_29 : f32 to vector<2x128xf32>
    %130 = arith.addf %129, %128 : vector<2x128xf32>
    %131 = arith.divf %129, %130 : vector<2x128xf32>
    %132 = arith.mulf %123, %105 : vector<2x128xf32>
    %133 = arith.mulf %117, %125 : vector<2x128xf32>
    %134 = arith.addf %132, %133 : vector<2x128xf32>
    %135 = math.tanh %134 : vector<2x128xf32>
    %136 = arith.mulf %131, %135 : vector<2x128xf32>
    %137 = vector.extract_strided_slice %21 {offsets = [8, 0], sizes = [2, 512], strides = [1, 1]} : vector<16x512xf32> to vector<2x512xf32>
    %138 = arith.truncf %136 : vector<2x128xf32> to vector<2x128xbf16>
    %cst_30 = arith.constant dense<0.000000e+00> : vector<2x512xf32>
    %139 = tpu.matmul %138, %22, %cst_30 {dimension_numbers = #tpu.dot_dimension_numbers<[1], [0], [0], [1], [0, 0, 1, 1], [], []>} : vector<2x128xbf16>, vector<128x512xbf16>, vector<2x512xf32> -> vector<2x512xf32>
    %140 = arith.addf %137, %139 : vector<2x512xf32>
    %141 = vector.extract_strided_slice %140 {offsets = [0, 0], sizes = [2, 128], strides = [1, 1]} : vector<2x512xf32> to vector<2x128xf32>
    %142 = arith.negf %141 : vector<2x128xf32>
    %143 = math.exp %142 : vector<2x128xf32>
    %cst_31 = arith.constant 1.000000e+00 : f32
    %144 = vector.broadcast %cst_31 : f32 to vector<2x128xf32>
    %145 = arith.addf %144, %143 : vector<2x128xf32>
    %146 = arith.divf %144, %145 : vector<2x128xf32>
    %147 = vector.extract_strided_slice %140 {offsets = [0, 128], sizes = [2, 128], strides = [1, 1]} : vector<2x512xf32> to vector<2x128xf32>
    %148 = arith.negf %147 : vector<2x128xf32>
    %149 = math.exp %148 : vector<2x128xf32>
    %cst_32 = arith.constant 1.000000e+00 : f32
    %150 = vector.broadcast %cst_32 : f32 to vector<2x128xf32>
    %151 = arith.addf %150, %149 : vector<2x128xf32>
    %152 = arith.divf %150, %151 : vector<2x128xf32>
    %153 = vector.extract_strided_slice %140 {offsets = [0, 256], sizes = [2, 128], strides = [1, 1]} : vector<2x512xf32> to vector<2x128xf32>
    %154 = math.tanh %153 : vector<2x128xf32>
    %155 = vector.extract_strided_slice %140 {offsets = [0, 384], sizes = [2, 128], strides = [1, 1]} : vector<2x512xf32> to vector<2x128xf32>
    %156 = arith.negf %155 : vector<2x128xf32>
    %157 = math.exp %156 : vector<2x128xf32>
    %cst_33 = arith.constant 1.000000e+00 : f32
    %158 = vector.broadcast %cst_33 : f32 to vector<2x128xf32>
    %159 = arith.addf %158, %157 : vector<2x128xf32>
    %160 = arith.divf %158, %159 : vector<2x128xf32>
    %161 = arith.mulf %152, %134 : vector<2x128xf32>
    %162 = arith.mulf %146, %154 : vector<2x128xf32>
    %163 = arith.addf %161, %162 : vector<2x128xf32>
    %164 = math.tanh %163 : vector<2x128xf32>
    %165 = arith.mulf %160, %164 : vector<2x128xf32>
    %166 = vector.extract_strided_slice %21 {offsets = [10, 0], sizes = [2, 512], strides = [1, 1]} : vector<16x512xf32> to vector<2x512xf32>
    %167 = arith.truncf %165 : vector<2x128xf32> to vector<2x128xbf16>
    %cst_34 = arith.constant dense<0.000000e+00> : vector<2x512xf32>
    %168 = tpu.matmul %167, %22, %cst_34 {dimension_numbers = #tpu.dot_dimension_numbers<[1], [0], [0], [1], [0, 0, 1, 1], [], []>} : vector<2x128xbf16>, vector<128x512xbf16>, vector<2x512xf32> -> vector<2x512xf32>
    %169 = arith.addf %166, %168 : vector<2x512xf32>
    %170 = vector.extract_strided_slice %169 {offsets = [0, 0], sizes = [2, 128], strides = [1, 1]} : vector<2x512xf32> to vector<2x128xf32>
    %171 = arith.negf %170 : vector<2x128xf32>
    %172 = math.exp %171 : vector<2x128xf32>
    %cst_35 = arith.constant 1.000000e+00 : f32
    %173 = vector.broadcast %cst_35 : f32 to vector<2x128xf32>
    %174 = arith.addf %173, %172 : vector<2x128xf32>
    %175 = arith.divf %173, %174 : vector<2x128xf32>
    %176 = vector.extract_strided_slice %169 {offsets = [0, 128], sizes = [2, 128], strides = [1, 1]} : vector<2x512xf32> to vector<2x128xf32>
    %177 = arith.negf %176 : vector<2x128xf32>
    %178 = math.exp %177 : vector<2x128xf32>
    %cst_36 = arith.constant 1.000000e+00 : f32
    %179 = vector.broadcast %cst_36 : f32 to vector<2x128xf32>
    %180 = arith.addf %179, %178 : vector<2x128xf32>
    %181 = arith.divf %179, %180 : vector<2x128xf32>
    %182 = vector.extract_strided_slice %169 {offsets = [0, 256], sizes = [2, 128], strides = [1, 1]} : vector<2x512xf32> to vector<2x128xf32>
    %183 = math.tanh %182 : vector<2x128xf32>
    %184 = vector.extract_strided_slice %169 {offsets = [0, 384], sizes = [2, 128], strides = [1, 1]} : vector<2x512xf32> to vector<2x128xf32>
    %185 = arith.negf %184 : vector<2x128xf32>
    %186 = math.exp %185 : vector<2x128xf32>
    %cst_37 = arith.constant 1.000000e+00 : f32
    %187 = vector.broadcast %cst_37 : f32 to vector<2x128xf32>
    %188 = arith.addf %187, %186 : vector<2x128xf32>
    %189 = arith.divf %187, %188 : vector<2x128xf32>
    %190 = arith.mulf %181, %163 : vector<2x128xf32>
    %191 = arith.mulf %175, %183 : vector<2x128xf32>
    %192 = arith.addf %190, %191 : vector<2x128xf32>
    %193 = math.tanh %192 : vector<2x128xf32>
    %194 = arith.mulf %189, %193 : vector<2x128xf32>
    %195 = vector.extract_strided_slice %21 {offsets = [12, 0], sizes = [2, 512], strides = [1, 1]} : vector<16x512xf32> to vector<2x512xf32>
    %196 = arith.truncf %194 : vector<2x128xf32> to vector<2x128xbf16>
    %cst_38 = arith.constant dense<0.000000e+00> : vector<2x512xf32>
    %197 = tpu.matmul %196, %22, %cst_38 {dimension_numbers = #tpu.dot_dimension_numbers<[1], [0], [0], [1], [0, 0, 1, 1], [], []>} : vector<2x128xbf16>, vector<128x512xbf16>, vector<2x512xf32> -> vector<2x512xf32>
    %198 = arith.addf %195, %197 : vector<2x512xf32>
    %199 = vector.extract_strided_slice %198 {offsets = [0, 0], sizes = [2, 128], strides = [1, 1]} : vector<2x512xf32> to vector<2x128xf32>
    %200 = arith.negf %199 : vector<2x128xf32>
    %201 = math.exp %200 : vector<2x128xf32>
    %cst_39 = arith.constant 1.000000e+00 : f32
    %202 = vector.broadcast %cst_39 : f32 to vector<2x128xf32>
    %203 = arith.addf %202, %201 : vector<2x128xf32>
    %204 = arith.divf %202, %203 : vector<2x128xf32>
    %205 = vector.extract_strided_slice %198 {offsets = [0, 128], sizes = [2, 128], strides = [1, 1]} : vector<2x512xf32> to vector<2x128xf32>
    %206 = arith.negf %205 : vector<2x128xf32>
    %207 = math.exp %206 : vector<2x128xf32>
    %cst_40 = arith.constant 1.000000e+00 : f32
    %208 = vector.broadcast %cst_40 : f32 to vector<2x128xf32>
    %209 = arith.addf %208, %207 : vector<2x128xf32>
    %210 = arith.divf %208, %209 : vector<2x128xf32>
    %211 = vector.extract_strided_slice %198 {offsets = [0, 256], sizes = [2, 128], strides = [1, 1]} : vector<2x512xf32> to vector<2x128xf32>
    %212 = math.tanh %211 : vector<2x128xf32>
    %213 = vector.extract_strided_slice %198 {offsets = [0, 384], sizes = [2, 128], strides = [1, 1]} : vector<2x512xf32> to vector<2x128xf32>
    %214 = arith.negf %213 : vector<2x128xf32>
    %215 = math.exp %214 : vector<2x128xf32>
    %cst_41 = arith.constant 1.000000e+00 : f32
    %216 = vector.broadcast %cst_41 : f32 to vector<2x128xf32>
    %217 = arith.addf %216, %215 : vector<2x128xf32>
    %218 = arith.divf %216, %217 : vector<2x128xf32>
    %219 = arith.mulf %210, %192 : vector<2x128xf32>
    %220 = arith.mulf %204, %212 : vector<2x128xf32>
    %221 = arith.addf %219, %220 : vector<2x128xf32>
    %222 = math.tanh %221 : vector<2x128xf32>
    %223 = arith.mulf %218, %222 : vector<2x128xf32>
    %224 = vector.extract_strided_slice %21 {offsets = [14, 0], sizes = [2, 512], strides = [1, 1]} : vector<16x512xf32> to vector<2x512xf32>
    %225 = arith.truncf %223 : vector<2x128xf32> to vector<2x128xbf16>
    %cst_42 = arith.constant dense<0.000000e+00> : vector<2x512xf32>
    %226 = tpu.matmul %225, %22, %cst_42 {dimension_numbers = #tpu.dot_dimension_numbers<[1], [0], [0], [1], [0, 0, 1, 1], [], []>} : vector<2x128xbf16>, vector<128x512xbf16>, vector<2x512xf32> -> vector<2x512xf32>
    %227 = arith.addf %224, %226 : vector<2x512xf32>
    %228 = vector.extract_strided_slice %227 {offsets = [0, 0], sizes = [2, 128], strides = [1, 1]} : vector<2x512xf32> to vector<2x128xf32>
    %229 = arith.negf %228 : vector<2x128xf32>
    %230 = math.exp %229 : vector<2x128xf32>
    %cst_43 = arith.constant 1.000000e+00 : f32
    %231 = vector.broadcast %cst_43 : f32 to vector<2x128xf32>
    %232 = arith.addf %231, %230 : vector<2x128xf32>
    %233 = arith.divf %231, %232 : vector<2x128xf32>
    %234 = vector.extract_strided_slice %227 {offsets = [0, 128], sizes = [2, 128], strides = [1, 1]} : vector<2x512xf32> to vector<2x128xf32>
    %235 = arith.negf %234 : vector<2x128xf32>
    %236 = math.exp %235 : vector<2x128xf32>
    %cst_44 = arith.constant 1.000000e+00 : f32
    %237 = vector.broadcast %cst_44 : f32 to vector<2x128xf32>
    %238 = arith.addf %237, %236 : vector<2x128xf32>
    %239 = arith.divf %237, %238 : vector<2x128xf32>
    %240 = vector.extract_strided_slice %227 {offsets = [0, 256], sizes = [2, 128], strides = [1, 1]} : vector<2x512xf32> to vector<2x128xf32>
    %241 = math.tanh %240 : vector<2x128xf32>
    %242 = vector.extract_strided_slice %227 {offsets = [0, 384], sizes = [2, 128], strides = [1, 1]} : vector<2x512xf32> to vector<2x128xf32>
    %243 = arith.negf %242 : vector<2x128xf32>
    %244 = math.exp %243 : vector<2x128xf32>
    %cst_45 = arith.constant 1.000000e+00 : f32
    %245 = vector.broadcast %cst_45 : f32 to vector<2x128xf32>
    %246 = arith.addf %245, %244 : vector<2x128xf32>
    %247 = arith.divf %245, %246 : vector<2x128xf32>
    %248 = arith.mulf %239, %221 : vector<2x128xf32>
    %249 = arith.mulf %233, %241 : vector<2x128xf32>
    %250 = arith.addf %248, %249 : vector<2x128xf32>
    %251 = math.tanh %250 : vector<2x128xf32>
    %252 = arith.mulf %247, %251 : vector<2x128xf32>
    %253 = vector.extract_strided_slice %49 {offsets = [0, 0], sizes = [2, 64], strides = [1, 1]} : vector<2x128xf32> to vector<2x64xf32>
    %254 = vector.extract_strided_slice %252 {offsets = [0, 64], sizes = [2, 64], strides = [1, 1]} : vector<2x128xf32> to vector<2x64xf32>
    %255 = tpu.concatenate %253, %254 in 1 : vector<2x64xf32>, vector<2x64xf32> -> vector<2x128xf32>
    %256 = vector.extract_strided_slice %78 {offsets = [0, 0], sizes = [2, 64], strides = [1, 1]} : vector<2x128xf32> to vector<2x64xf32>
    %257 = vector.extract_strided_slice %223 {offsets = [0, 64], sizes = [2, 64], strides = [1, 1]} : vector<2x128xf32> to vector<2x64xf32>
    %258 = tpu.concatenate %256, %257 in 1 : vector<2x64xf32>, vector<2x64xf32> -> vector<2x128xf32>
    %259 = vector.extract_strided_slice %107 {offsets = [0, 0], sizes = [2, 64], strides = [1, 1]} : vector<2x128xf32> to vector<2x64xf32>
    %260 = vector.extract_strided_slice %194 {offsets = [0, 64], sizes = [2, 64], strides = [1, 1]} : vector<2x128xf32> to vector<2x64xf32>
    %261 = tpu.concatenate %259, %260 in 1 : vector<2x64xf32>, vector<2x64xf32> -> vector<2x128xf32>
    %262 = vector.extract_strided_slice %136 {offsets = [0, 0], sizes = [2, 64], strides = [1, 1]} : vector<2x128xf32> to vector<2x64xf32>
    %263 = vector.extract_strided_slice %165 {offsets = [0, 64], sizes = [2, 64], strides = [1, 1]} : vector<2x128xf32> to vector<2x64xf32>
    %264 = tpu.concatenate %262, %263 in 1 : vector<2x64xf32>, vector<2x64xf32> -> vector<2x128xf32>
    %265 = vector.extract_strided_slice %165 {offsets = [0, 0], sizes = [2, 64], strides = [1, 1]} : vector<2x128xf32> to vector<2x64xf32>
    %266 = vector.extract_strided_slice %136 {offsets = [0, 64], sizes = [2, 64], strides = [1, 1]} : vector<2x128xf32> to vector<2x64xf32>
    %267 = tpu.concatenate %265, %266 in 1 : vector<2x64xf32>, vector<2x64xf32> -> vector<2x128xf32>
    %268 = vector.extract_strided_slice %194 {offsets = [0, 0], sizes = [2, 64], strides = [1, 1]} : vector<2x128xf32> to vector<2x64xf32>
    %269 = vector.extract_strided_slice %107 {offsets = [0, 64], sizes = [2, 64], strides = [1, 1]} : vector<2x128xf32> to vector<2x64xf32>
    %270 = tpu.concatenate %268, %269 in 1 : vector<2x64xf32>, vector<2x64xf32> -> vector<2x128xf32>
    %271 = vector.extract_strided_slice %223 {offsets = [0, 0], sizes = [2, 64], strides = [1, 1]} : vector<2x128xf32> to vector<2x64xf32>
    %272 = vector.extract_strided_slice %78 {offsets = [0, 64], sizes = [2, 64], strides = [1, 1]} : vector<2x128xf32> to vector<2x64xf32>
    %273 = tpu.concatenate %271, %272 in 1 : vector<2x64xf32>, vector<2x64xf32> -> vector<2x128xf32>
    %274 = vector.extract_strided_slice %252 {offsets = [0, 0], sizes = [2, 64], strides = [1, 1]} : vector<2x128xf32> to vector<2x64xf32>
    %275 = vector.extract_strided_slice %49 {offsets = [0, 64], sizes = [2, 64], strides = [1, 1]} : vector<2x128xf32> to vector<2x64xf32>
    %276 = tpu.concatenate %274, %275 in 1 : vector<2x64xf32>, vector<2x64xf32> -> vector<2x128xf32>
    %277 = tpu.concatenate %255, %258, %261, %264, %267, %270, %273, %276 in 0 : vector<2x128xf32>, vector<2x128xf32>, vector<2x128xf32>, vector<2x128xf32>, vector<2x128xf32>, vector<2x128xf32>, vector<2x128xf32>, vector<2x128xf32> -> vector<16x128xf32>
    %cst_46 = arith.constant 0.000000e+00 : f32
    %278 = vector.broadcast %cst_46 : f32 to vector<16x128xf32>
    %279 = arith.maximumf %277, %278 : vector<16x128xf32>
    %280 = arith.truncf %279 : vector<16x128xf32> to vector<16x128xbf16>
    %c0_47 = arith.constant 0 : index
    %c0_48 = arith.constant 0 : index
    %281 = vector.load %arg6[%c0_47, %c0_48] : memref<128x19xbf16, #tpu.memory_space<vmem>>, vector<128x19xbf16>
    %cst_49 = arith.constant dense<0.000000e+00> : vector<16x19xf32>
    %282 = tpu.matmul %280, %281, %cst_49 {dimension_numbers = #tpu.dot_dimension_numbers<[1], [0], [0], [1], [0, 0, 1, 1], [], []>} : vector<16x128xbf16>, vector<128x19xbf16>, vector<16x19xf32> -> vector<16x19xf32>
    %c0_50 = arith.constant 0 : index
    %c0_51 = arith.constant 0 : index
    %283 = vector.load %arg7[%c0_50, %c0_51] : memref<1x19xf32, #tpu.memory_space<vmem>>, vector<1x19xf32>
    %284 = vector.broadcast %283 : vector<1x19xf32> to vector<16x19xf32>
    %285 = arith.addf %282, %284 : vector<16x19xf32>
    %cst_52 = arith.constant dense<0xFF800000> : vector<16xf32>
    %286 = vector.multi_reduction <maximumf>, %285, %cst_52 [1] : vector<16x19xf32> to vector<16xf32>
    %287 = vector.shape_cast %286 : vector<16xf32> to vector<16x1xf32>
    %288 = vector.broadcast %287 : vector<16x1xf32> to vector<16x19xf32>
    %289 = arith.subf %285, %288 : vector<16x19xf32>
    %290 = math.exp %289 : vector<16x19xf32>
    %cst_53 = arith.constant 1.900000e+01 : f32
    %291 = vector.broadcast %cst_53 : f32 to vector<16x19xf32>
    %292 = arith.mulf %290, %291 : vector<16x19xf32>
    %cst_54 = arith.constant dense<0.000000e+00> : vector<16xf32>
    %293 = vector.multi_reduction <add>, %290, %cst_54 [1] : vector<16x19xf32> to vector<16xf32>
    %294 = vector.shape_cast %293 : vector<16xf32> to vector<16x1xf32>
    %295 = vector.broadcast %294 : vector<16x1xf32> to vector<16x19xf32>
    %296 = arith.cmpf ogt, %292, %295 : vector<16x19xf32>
    %297 = arith.extui %296 : vector<16x19xi1> to vector<16x19xi32>
    %298 = arith.sitofp %297 : vector<16x19xi32> to vector<16x19xf32>
    %299 = arith.truncf %298 : vector<16x19xf32> to vector<16x19xbf16>
    %c0_55 = arith.constant 0 : index
    %c0_56 = arith.constant 0 : index
    %300 = vector.load %arg8[%c0_55, %c0_56] : memref<128x32xbf16, #tpu.memory_space<vmem>>, vector<128x32xbf16>
    %cst_57 = arith.constant dense<0.000000e+00> : vector<16x32xf32>
    %301 = tpu.matmul %280, %300, %cst_57 {dimension_numbers = #tpu.dot_dimension_numbers<[1], [0], [0], [1], [0, 0, 1, 1], [], []>} : vector<16x128xbf16>, vector<128x32xbf16>, vector<16x32xf32> -> vector<16x32xf32>
    %c0_58 = arith.constant 0 : index
    %c0_59 = arith.constant 0 : index
    %302 = vector.load %arg9[%c0_58, %c0_59] : memref<19x32xbf16, #tpu.memory_space<vmem>>, vector<19x32xbf16>
    %cst_60 = arith.constant dense<0.000000e+00> : vector<16x32xf32>
    %303 = tpu.matmul %299, %302, %cst_60 {dimension_numbers = #tpu.dot_dimension_numbers<[1], [0], [0], [1], [0, 0, 1, 1], [], []>} : vector<16x19xbf16>, vector<19x32xbf16>, vector<16x32xf32> -> vector<16x32xf32>
    %304 = arith.addf %301, %303 : vector<16x32xf32>
    %c0_61 = arith.constant 0 : index
    %c0_62 = arith.constant 0 : index
    %305 = vector.load %arg10[%c0_61, %c0_62] : memref<1x32xf32, #tpu.memory_space<vmem>>, vector<1x32xf32>
    %306 = vector.broadcast %305 : vector<1x32xf32> to vector<16x32xf32>
    %307 = arith.addf %304, %306 : vector<16x32xf32>
    %cst_63 = arith.constant 0.000000e+00 : f32
    %308 = vector.broadcast %cst_63 : f32 to vector<16x32xf32>
    %309 = arith.maximumf %307, %308 : vector<16x32xf32>
    %310 = arith.truncf %309 : vector<16x32xf32> to vector<16x32xbf16>
    %c0_64 = arith.constant 0 : index
    %c0_65 = arith.constant 0 : index
    %311 = vector.load %arg11[%c0_64, %c0_65] : memref<32x128xbf16, #tpu.memory_space<vmem>>, vector<32x128xbf16>
    %cst_66 = arith.constant dense<0.000000e+00> : vector<16x128xf32>
    %312 = tpu.matmul %310, %311, %cst_66 {dimension_numbers = #tpu.dot_dimension_numbers<[1], [0], [0], [1], [0, 0, 1, 1], [], []>} : vector<16x32xbf16>, vector<32x128xbf16>, vector<16x128xf32> -> vector<16x128xf32>
    %c0_67 = arith.constant 0 : index
    %c0_68 = arith.constant 0 : index
    %313 = vector.load %arg12[%c0_67, %c0_68] : memref<1x128xf32, #tpu.memory_space<vmem>>, vector<1x128xf32>
    %314 = vector.broadcast %313 : vector<1x128xf32> to vector<16x128xf32>
    %315 = arith.addf %312, %314 : vector<16x128xf32>
    %c0_69 = arith.constant 0 : index
    %c0_70 = arith.constant 0 : index
    %316 = vector.load %arg13[%c0_69, %c0_70] : memref<16x128xf32, #tpu.memory_space<vmem>>, vector<16x128xf32>
    tpu.vector_store %arg13[%c0_69, %c0_70], %315 {strides = array<i32>} : memref<16x128xf32, #tpu.memory_space<vmem>>, vector<16x128xf32>,
    return
  }
}

</mosaic_0001>

<bundles_post_ra>
// kernel: tpu_custom_call.1
= control target key start
LH: loop header
LB: loop body
LE: loop exit
PB: predicated region body
PF: predicated region fallthrough
CT: control target
= control target key end

     0   :  { %18 = vsyncpa [#allocation3], 0  ;;  %s3295_s0 = inlined_call_operand.vmem [shape: s32[32,1], index: 0, kind: input, shape index: {}]   ;;  %s3296_s1 = inlined_call_operand.vmem [shape: bf16[50,32], index: 1, kind: input, shape index: {}]   ;;  %s3297_s2 = inlined_call_operand.vmem [shape: bf16[32,512], index: 2, kind: input, shape index: {}]   ;;  %s3298_s3 = inlined_call_operand.vmem [shape: bf16[32,512], index: 3, kind: input, shape index: {}]   ;;  %s3299_s4 = inlined_call_operand.hbm [shape: bf16[128,512], index: 4, kind: input, shape index: {}]   ;;  %s3300_s5 = inlined_call_operand.vmem [shape: f32[1,512], index: 5, kind: input, shape index: {}]   ;;  %s3301_s6 = inlined_call_operand.vmem [shape: bf16[128,19], index: 6, kind: input, shape index: {}]   ;;  %s3302_s7 = inlined_call_operand.vmem [shape: f32[1,19], index: 7, kind: input, shape index: {}]   ;;  %s3303_s8 = inlined_call_operand.vmem [shape: bf16[128,32], index: 8, kind: input, shape index: {}]   ;;  %s3304_s9 = inlined_call_operand.vmem [shape: bf16[19,32], index: 9, kind: input, shape index: {}]   ;;  %s3305_s10 = inlined_call_operand.vmem [shape: f32[1,32], index: 10, kind: input, shape index: {}]   ;;  %s3306_s11 = inlined_call_operand.vmem [shape: bf16[32,128], index: 11, kind: input, shape index: {}]   ;;  %s3307_s12 = inlined_call_operand.vmem [shape: f32[1,128], index: 12, kind: input, shape index: {}]   ;;  %s3308_s13 = inlined_call_operand.hbm [shape: f32[16,128], index: 13, kind: output, shape index: {}]  }
   0x1   :  { %19 = vsyncpa [#allocation4], 0  ;;  %s2575_s25 = smov [#allocation2]   ;;  %s2527_s29 = scalar_lea.hbm %s3299_s4, 4096 }
   0x2   :  { %s33_s26 = sshll.u32 %s2575_s25, 4  ;;  %p2528_p0 = scmp.ne.s32.totalorder %s3299_s4, %s2527_s29  ;;  %s34_s26 = int_to_ptr.vmem [resolvable:$true] %s33_s26 }
   0x3   :  { %p2531_p1 = scmp.lt.u32.totalorder %s2527_s29, %s3299_s4 }
   0x5   :  { %p2533_p2 = pnand %p2531_p1, %p2528_p0 }
   0x7   :  { %2536 = shalt.err (!%p2533_p2)
}
   0x8   :  { %s2537_s17 = scalar_lea.vmem %s34_s26, 4096  ;;  %p2542_p4 = scmp.lt.s32.totalorder %s34_s26, %s34_s26 }
   0x9   :  { %p2538_p3 = scmp.ne.s32.totalorder %s34_s26, %s2537_s17  ;;  %p2543_p5 = scmp.lt.s32.totalorder %s2537_s17, %s2537_s17 }
   0xb   :  { %p2544_p6 = por %p2543_p5, %p2542_p4 }
   0xd   :  { %p2545_p7 = pnand %p2544_p6, %p2538_p3 }
   0xf   :  { %2548 = shalt.err (!%p2545_p7)
}
  0x10   :  { %s2576_s18 = smov 256   ;;  %s2577_s19 = smov 16  }
  0x11   :  { %39 = dma.hbm_to_vmem [thread:$0]  %s3299_s4, 4096, %s34_s26, [#allocation3], %s2576_s18, %s2576_s18, %s2577_s19  }
  0x12   :  { %2571 = dma.done.wait [#allocation3], 4096  }
  0x13   :  { %2572 = vsyncadd [#allocation3], 4294963200  ;;  %v2578_v0 = vmov 0   ;;  %v62_v1 = vld [vmem:[%s3295_s0 + $0x10] sm:$0xff]  ;;  %v60_v2 = vld [vmem:[%s3295_s0] sm:$0xff]  ;;  %vm127_vm0 = vcmask 1040384   ;;  %v64_v13 = vlaneseq }
  0x14   :  { %2272 = vset.pattern.permute.xlu1 %v2578_v0  ;;  %2271 = vset.pattern.permute.xlu0 %v2578_v0  ;;  %v63_v3 = vld [vmem:[%s3295_s0 + $0x18] sm:$0xff]  ;;  %v61_v4 = vld [vmem:[%s3295_s0 + $0x8] sm:$0xff]  ;;  %v2273_v5 = vld [vmem:[%s3296_s1] sm:$0xff]   ;;  %vm120_vm5 = vcmask 408576   ;;  %v2579_v19 = vmov 0.0   ;;  %vm242_vm6 = vcmask 261120  }
  0x15   :  { %321 = vmatprep.mubr.bf16.mxu1 %v2578_v0  ;;  %73 = vperm.xlu1 %2272, %v62_v1   ;;  %v2274_v6 = vld [vmem:[%s3296_s1 + $0x8] sm:$0xff]   ;;  %v2275_v7 = vld [vmem:[%s3296_s1 + $0x10] sm:$0xff]   ;;  %v2276_v8 = vld [vmem:[%s3296_s1 + $0x18] ss:$0 sps:$4 sm:$0x11]   ;;  %v65_v14 = vand.u32 127, %v64_v13 }
  0x16   :  { %67 = vperm.xlu0 %2271, %v60_v2   ;;  %2184 = vmatprep.subr.bf16.mxu0 %v2273_v5  ;;  %v2277_v9 = vld [vmem:[%s3298_s3 + $0xc] ss:$16 sps:$4 sm:$0xff]   ;;  %v2282_v10 = vld [vmem:[%s3298_s3 + $0x8] ss:$16 sps:$4 sm:$0xff]   ;;  %v2281_v11 = vld [vmem:[%s3298_s3 + $0x4] ss:$16 sps:$4 sm:$0xff]  }
  0x17   :  { %2185 = vmatpush3.bf16.msra.mxu0 %v2273_v5  ;;  %289 = vmatprep.subr.bf16.mxu1 %v2277_v9  ;;  %v129_v12 = vsel %vm127_vm0, %v2276_v8, 0  ;;  %v2279_v26 = vld [vmem:[%s3298_s3] ss:$16 sps:$4 sm:$0xff]   ;;  %v2283_v27 = vld [vmem:[%s3298_s3 + $0x2c] ss:$16 sps:$4 sm:$0xff]   ;;  %vm1595_vm7 = vcmask 523264  }
  0x18   :  { %2186 = vmatprep.subr.bf16.mxu0 %v2274_v6  ;;  %290 = vmatpush1.bf16.msra.mxu1 %v2282_v10  ;;  %v2287_v28 = vld [vmem:[%s3298_s3 + $0x24] ss:$16 sps:$4 sm:$0xff]   ;;  %v2285_v29 = vld [vmem:[%s3298_s3 + $0x20] ss:$16 sps:$4 sm:$0xff]   ;;  %v2288_v30 = vld [vmem:[%s3298_s3 + $0x28] ss:$16 sps:$4 sm:$0xff]  }
  0x19   :  { %76 = vperm.xlu1 %2272, %v63_v3   ;;  %291 = vmatprep.subr.bf16.mxu1 %v2283_v27  ;;  %v2291_v31 = vld [vmem:[%s3297_s2 + $0x4] ss:$16 sps:$4 sm:$0xff]   ;;  %v2289_v40 = vld [vmem:[%s3297_s2] ss:$16 sps:$4 sm:$0xff]   ;;  %v2297_v45 = vld [vmem:[%s3297_s2 + $0xc] ss:$16 sps:$4 sm:$0xff]  }
  0x1a   :  { %70 = vperm.xlu0 %2271, %v61_v4   ;;  %v2294_v42 = vld [vmem:[%s3297_s2 + $0x24] ss:$16 sps:$4 sm:$0xff]   ;;  %v2292_v44 = vld [vmem:[%s3297_s2 + $0x20] ss:$16 sps:$4 sm:$0xff]   ;;  %v2295_v46 = vld [vmem:[%s3297_s2 + $0x8] ss:$16 sps:$4 sm:$0xff]  }
  0x1b   :  { %2187 = vmatpush3.bf16.msra.mxu0 %v2274_v6  ;;  %v2300_v47 = vld [vmem:[%s3297_s2 + $0x2c] ss:$16 sps:$4 sm:$0xff]   ;;  %v2298_v48 = vld [vmem:[%s3297_s2 + $0x28] ss:$16 sps:$4 sm:$0xff]   ;;  %v2758_v49 = vld [vmem:[#allocation2 + $0x4] ss:$16 sps:$4 sm:$0xff]  }
  0x1c   :  { %2188 = vmatprep.subr.bf16.mxu0 %v2275_v7  ;;  %292 = vmatpush1.bf16.msra.mxu1 %v2288_v30  ;;  %v2760_v50 = vld [vmem:[#allocation2 + $0xc] ss:$16 sps:$4 sm:$0xff]   ;;  %v2762_v51 = vld [vmem:[#allocation2] ss:$16 sps:$4 sm:$0xff]   ;;  %v2764_v52 = vld [vmem:[#allocation2 + $0x8] ss:$16 sps:$4 sm:$0xff]  }
  0x1d   :  { %375 = vmatprep.subr.bf16.mxu1 %v2291_v31  ;;  %v2770_v53 = vld [vmem:[#allocation2 + $0x24] ss:$16 sps:$4 sm:$0xff]   ;;  %v2772_v54 = vld [vmem:[#allocation2 + $0x2c] ss:$16 sps:$4 sm:$0xff]   ;;  %v2774_v55 = vld [vmem:[#allocation2 + $0x20] ss:$16 sps:$4 sm:$0xff]  }
  0x1e   :  { %v2776_v56 = vld [vmem:[#allocation2 + $0x28] ss:$16 sps:$4 sm:$0xff]   ;;  %v2782_v57 = vld [vmem:[#allocation2 + $0x44] ss:$16 sps:$4 sm:$0xff]   ;;  %v2784_v58 = vld [vmem:[#allocation2 + $0x4c] ss:$16 sps:$4 sm:$0xff]  }
  0x1f   :  { %2189 = vmatpush3.bf16.msra.mxu0 %v2275_v7  ;;  %v2786_v59 = vld [vmem:[#allocation2 + $0x40] ss:$16 sps:$4 sm:$0xff]   ;;  %v2788_v60 = vld [vmem:[#allocation2 + $0x48] ss:$16 sps:$4 sm:$0xff]   ;;  %v2794_v61 = vld [vmem:[#allocation2 + $0x64] ss:$16 sps:$4 sm:$0xff]  }
  0x20   :  { %2260 = vmatprep.subr.msk.bf16.mxu0 %vm127_vm0, %v2276_v8  ;;  %v2796_v62 = vld [vmem:[#allocation2 + $0x6c] ss:$16 sps:$4 sm:$0xff]   ;;  %v2798_v63 = vld [vmem:[#allocation2 + $0x60] ss:$16 sps:$4 sm:$0xff]   ;;  %v2800_v1 = vld [vmem:[#allocation2 + $0x68] ss:$16 sps:$4 sm:$0xff]  }
  0x21   :  { %v2806_v2 = vld [vmem:[#allocation2 + $0x84] ss:$16 sps:$4 sm:$0xff]   ;;  %v2808_v3 = vld [vmem:[#allocation2 + $0x8c] ss:$16 sps:$4 sm:$0xff]   ;;  %v2810_v4 = vld [vmem:[#allocation2 + $0x80] ss:$16 sps:$4 sm:$0xff]  }
  0x22   :  { %v2812_v5 = vld [vmem:[#allocation2 + $0x88] ss:$16 sps:$4 sm:$0xff]   ;;  %v2814_v6 = vld [vmem:[#allocation2 + $0xa4] ss:$16 sps:$4 sm:$0xff]   ;;  %v2818_v7 = vld [vmem:[#allocation2 + $0xac] ss:$16 sps:$4 sm:$0xff]  }
  0x23   :  { %2191 = vmatpush3.bf16.msra.mxu0 %v129_v12  ;;  %v2822_v8 = vld [vmem:[#allocation2 + $0xa0] ss:$16 sps:$4 sm:$0xff]   ;;  %v2824_v9 = vld [vmem:[#allocation2 + $0xa8] ss:$16 sps:$4 sm:$0xff]   ;;  %v2828_v10 = vld [vmem:[#allocation2 + $0xc4] ss:$16 sps:$4 sm:$0xff]  }
  0x24   :  { %246 = vmatprep.subr.bf16.mxu0 %v2281_v11  ;;  %v2830_v11 = vld [vmem:[#allocation2 + $0xcc] ss:$16 sps:$4 sm:$0xff]   ;;  %v2834_v12 = vld [vmem:[#allocation2 + $0xc0] ss:$16 sps:$4 sm:$0xff]   ;;  %vm1625_vm8 = vcmask 1041408   ;;  %vm1627_vm9 = vcmask 1043456  }
  0x25   :  { %vm2580_vm10 = vmmov 0   ;;  %vm1629_vm11 = vcmask 1045504   ;;  %vm1749_vm12 = vcmask 154624  }
  0x94   :  { %v74_v15 = vpop.permute.xlu1 %73 }
  0x95   :  { %v68_v16 = vpop.permute.xlu0 %67  ;;  %vm80_vm1 = vcmp.eq.s32.totalorder %v74_v15, %v65_v14  ;;  %v2840_v15 = vld [vmem:[#allocation2 + $0xe4] ss:$16 sps:$4 sm:$0xff]  }
  0x96   :  { %vm78_vm2 = vcmp.eq.s32.totalorder %v68_v16, %v65_v14  ;;  %v2043_v20 = vsel %vm80_vm1, 1.0, %v2579_v19  ;;  %v2842_v16 = vld [vmem:[#allocation2 + $0xec] ss:$16 sps:$4 sm:$0xff]  }
  0x97   :  { %v2041_v21 = vsel %vm78_vm2, 1.0, %v2579_v19 }
  0x98   :  { %v77_v17 = vpop.permute.xlu1 %76 }
  0x99   :  { %v71_v18 = vpop.permute.xlu0 %70  ;;  %vm81_vm3 = vcmp.eq.s32.totalorder %v77_v17, %v65_v14  ;;  %v2846_v17 = vld [vmem:[#allocation2 + $0xe0] ss:$16 sps:$4 sm:$0xff]  }
  0x9a   :  { %vm79_vm4 = vcmp.eq.s32.totalorder %v71_v18, %v65_v14  ;;  %v2044_v22 = vsel %vm81_vm3, 1.0, %v2579_v19  ;;  %v2836_v14 = vld [vmem:[#allocation2 + $0xc8] ss:$16 sps:$4 sm:$0xff]  }
  0x9b   :  { %v2042_v23 = vsel %vm79_vm4, 1.0, %v2579_v19  ;;  %v91_v24 = vpack.c.bf16 %v2044_v22, %v2043_v20  ;;  %v2848_v18 = vld [vmem:[#allocation2 + $0xe8] ss:$16 sps:$4 sm:$0xff]   ;;  %v464_v20 = vshrl.u32 %v64_v13, 7 }
  0x9c   :  { %v90_v25 = vpack.c.bf16 %v2042_v23, %v2041_v21 }
  0x9d   :  { %v469_v27 = vsub.s32 1, %v464_v20 }
  0x9e   :  { %2192 = vmatprep.mubr.msk.bf16.mxu0 %vm120_vm5, %v90_v25  ;;  %v465_v25 = vsub.s32 0, %v464_v20 }
  0x9f   :  { %2193 = vmatmul.mubr.msk.bf16.vlgmr.msra.gmra.mrb[0].mxu0 %vm120_vm5, %v91_v24 }
  0xa0   :  { %247 = vmatpush1.bf16.msra.mxu0 %v2279_v26  ;;  %278 = vmatprep.mubr.bf16.mxu0 %v2578_v0  ;;  %v461_v26 = vld [vmem:[%s3300_s5] sm:$0xf] }
  0xa1   :  { %248 = vmatprep.subr.bf16.mxu0 %v2287_v28  ;;  %v466_v28 = vrot.slane %v461_v26, %v465_v25  ;;  %v470_v30 = vrot.slane %v461_v26, %v469_v27 }
  0xa4   :  { %249 = vmatpush1.bf16.msra.mxu0 %v2285_v29 }
  0xa5   :  { %708 = vmatprep.subr.bf16.mxu0 %v2758_v49 }
 0x172   :  { %v2194_v32 = vpop.f32.mrb[0].mxu0 }
 0x173   :  { %v165_v33 = vpop.f32.mrb[1].mxu0  ;;  %v182_v35 = vmax.f32 %v2194_v32, 0.0 }
 0x174   :  { %v2195_v34 = vpop.f32.mrb[2].mxu0  ;;  %v180_v38 = vmax.f32 %v165_v33, 0.0  ;;  %v473_v33 = vsub.s32 2, %v464_v20 }
 0x175   :  { %v183_v36 = vmax.f32 %v2195_v34, 0.0  ;;  %v168_v37 = vpop.f32.mrb[3].mxu0 }
 0x176   :  { %v181_v39 = vmax.f32 %v168_v37, 0.0 }
 0x177   :  { %v185_v41 = vpack.c.bf16 %v183_v36, %v182_v35  ;;  %v477_v36 = vsub.s32 3, %v464_v20 }
 0x178   :  { %v184_v43 = vpack.c.bf16 %v181_v39, %v180_v38 }
 0x179   :  { %2059 = vmatmul.mubr.msk.bf16.vlgmr.msra.gmra.mrb[4].mxu0 %vm242_vm6, %v185_v41  ;;  %2060 = vmatmul.mubr.msk.bf16.vlgmr.msra.gmra.mrb[0].mxu1 %vm242_vm6, %v185_v41 }
 0x17a   :  { %376 = vmatpush1.bf16.msra.mxu1 %v2289_v40  ;;  %407 = vmatprep.mubr.bf16.mxu1 %v2578_v0 }
 0x17b   :  { %377 = vmatprep.subr.bf16.mxu1 %v2294_v42  ;;  %740 = vmatprep.mubr.bf16.mxu0 %v2578_v0 }
 0x17c   :  { %709 = vmatpush1.bf16.msra.mxu0 %v2762_v51 }
 0x17d   :  { %710 = vmatprep.subr.bf16.mxu0 %v2770_v53 }
 0x17e   :  { %378 = vmatpush1.bf16.msra.mxu1 %v2292_v44 }
 0x17f   :  { %418 = vmatprep.subr.bf16.mxu1 %v2297_v45 }
 0x180   :  { %711 = vmatpush1.bf16.msra.mxu0 %v2774_v55 }
 0x181   :  { %2069 = vmatmul.mubr.msk.bf16.vlgmr.msra.gmra.mrb[4].mxu1 %vm242_vm6, %v184_v43  ;;  %712 = vmatprep.subr.bf16.mxu0 %v2782_v57 }
 0x182   :  { %419 = vmatpush1.bf16.msra.mxu1 %v2295_v46  ;;  %450 = vmatprep.mubr.bf16.mxu1 %v2578_v0  ;;  %v478_v46 = vrot.slane %v461_v26, %v477_v36 }
 0x183   :  { %420 = vmatprep.subr.bf16.mxu1 %v2300_v47 }
 0x184   :  { %713 = vmatpush1.bf16.msra.mxu0 %v2786_v59 }
 0x185   :  { %714 = vmatprep.subr.bf16.mxu0 %v2794_v61 }
 0x186   :  { %421 = vmatpush1.bf16.msra.mxu1 %v2298_v48 }
 0x187   :  { %749 = vmatprep.subr.bf16.mxu1 %v2760_v50 }
 0x188   :  { %715 = vmatpush1.bf16.msra.mxu0 %v2798_v63 }
 0x189   :  { %2070 = vmatmul.mubr.msk.bf16.vlgmr.msra.gmra.mrb[0].mxu1 %vm242_vm6, %v184_v43  ;;  %716 = vmatprep.subr.bf16.mxu0 %v2806_v2  ;;  %v474_v43 = vrot.slane %v461_v26, %v473_v33 }
 0x18a   :  { %781 = vmatprep.mubr.bf16.mxu1 %v2578_v0  ;;  %750 = vmatpush1.bf16.msra.mxu1 %v2764_v52 }
 0x18b   :  { %751 = vmatprep.subr.bf16.mxu1 %v2772_v54 }
 0x18c   :  { %717 = vmatpush1.bf16.msra.mxu0 %v2810_v4 }
 0x18d   :  { %718 = vmatprep.subr.bf16.mxu0 %v2814_v6 }
 0x18e   :  { %752 = vmatpush1.bf16.msra.mxu1 %v2776_v56 }
 0x18f   :  { %753 = vmatprep.subr.bf16.mxu1 %v2784_v58 }
 0x190   :  { %719 = vmatpush1.bf16.msra.mxu0 %v2822_v8 }
 0x191   :  { %720 = vmatprep.subr.bf16.mxu0 %v2828_v10 }
 0x192   :  { %754 = vmatpush1.bf16.msra.mxu1 %v2788_v60 }
 0x193   :  { %755 = vmatprep.subr.bf16.mxu1 %v2796_v62 }
 0x194   :  { %721 = vmatpush1.bf16.msra.mxu0 %v2834_v12 }
 0x195   :  { %722 = vmatprep.subr.bf16.mxu0 %v2840_v15 }
 0x196   :  { %756 = vmatpush1.bf16.msra.mxu1 %v2800_v1 }
 0x197   :  { %757 = vmatprep.subr.bf16.mxu1 %v2808_v3 }
 0x198   :  { %723 = vmatpush1.bf16.msra.mxu0 %v2846_v17 }
 0x199   :  { %837 = vmatprep.subr.bf16.mxu0 %v2758_v49 }
 0x19a   :  { %758 = vmatpush1.bf16.msra.mxu1 %v2812_v5 }
 0x19b   :  { %759 = vmatprep.subr.bf16.mxu1 %v2818_v7 }
 0x19e   :  { %760 = vmatpush1.bf16.msra.mxu1 %v2824_v9 }
 0x19f   :  { %761 = vmatprep.subr.bf16.mxu1 %v2830_v11 }
 0x1a2   :  { %762 = vmatpush1.bf16.msra.mxu1 %v2836_v14 }
 0x1a3   :  { %763 = vmatprep.subr.bf16.mxu1 %v2842_v16 }
 0x1a6   :  { %764 = vmatpush1.bf16.msra.mxu1 %v2848_v18 }
 0x1a7   :  { %878 = vmatprep.subr.bf16.mxu1 %v2760_v50 }
 0x24c   :  { %v280_v21 = vpop.f32.mrb[4].mxu0 }
 0x24d   :  { %v282_v22 = vpop.f32.mrb[5].mxu0 }
 0x24e   :  { %v284_v23 = vpop.f32.mrb[6].mxu0 }
 0x24f   :  { %v286_v24 = vpop.f32.mrb[7].mxu0 }
 0x254   :  { %v409_v29 = vpop.f32.mrb[4].mxu1 }
 0x255   :  { %v410_v31 = vadd.f32 %v409_v29, %v280_v21  ;;  %v411_v32 = vpop.f32.mrb[5].mxu1 }
 0x256   :  { %v412_v34 = vadd.f32 %v411_v32, %v282_v22  ;;  %v413_v35 = vpop.f32.mrb[6].mxu1 }
 0x257   :  { %v2860_v13 = vadd.f32 %v466_v28, %v410_v31  ;;  %v414_v37 = vadd.f32 %v413_v35, %v284_v23  ;;  %v415_v38 = vpop.f32.mrb[7].mxu1 }
 0x258   :  { %v2862_v39 = vadd.f32 %v470_v30, %v412_v34  ;;  %v416_v40 = vadd.f32 %v415_v38, %v286_v24 }
 0x259   :  { %v2071_v41 = vmul.f32 -1.442695, %v2860_v13  ;;  %v2865_v42 = vadd.f32 %v466_v28, %v414_v37 }
 0x25a   :  { %v2072_v44 = vmul.f32 -1.442695, %v2862_v39  ;;  %v2868_v45 = vadd.f32 %v470_v30, %v416_v40 }
 0x25b   :  { %2369 = vpow2.f32 %v2071_v41 }
 0x25c   :  { %2371 = vpow2.f32 %v2072_v44  ;;  %v452_v47 = vpop.f32.mrb[0].mxu1 }
 0x25d   :  { %v2870_v48 = vadd.f32 %v474_v43, %v452_v47  ;;  %v454_v20 = vpop.f32.mrb[1].mxu1 }
 0x25e   :  { %v2872_v21 = vadd.f32 %v478_v46, %v454_v20  ;;  %v456_v22 = vpop.f32.mrb[2].mxu1 }
 0x25f   :  { %v2874_v23 = vadd.f32 %v474_v43, %v456_v22  ;;  %v458_v24 = vpop.f32.mrb[3].mxu1 }
 0x260   :  { %v2876_v25 = vadd.f32 %v478_v46, %v458_v24  ;;  %v2073_v27 = vmul.f32 -1.442695, %v2872_v21 }
 0x262   :  { %2373 = vpow2.f32 %v2073_v27 }
 0x263   :  { %2375 = vtanh.f32 %v2870_v48 }
 0x265   :  { %v2370_v28 = vpop.eup %2369 }
 0x266   :  { %v2372_v29 = vpop.eup %2371  ;;  %v526_v30 = vadd.f32 1.0, %v2370_v28 }
 0x267   :  { %v532_v26 = vadd.f32 1.0, %v2372_v29 }
 0x268   :  { %2377 = vrcp.f32 %v526_v30 }
 0x269   :  { %2379 = vrcp.f32 %v532_v26 }
 0x26c   :  { %v2374_v31 = vpop.eup %2373 }
 0x26d   :  { %v2376_v32 = vpop.eup %2375  ;;  %v539_v36 = vadd.f32 1.0, %v2374_v31 }
 0x26f   :  { %2381 = vrcp.f32 %v539_v36 }
 0x272   :  { %v2378_v33 = vpop.eup %2377 }
 0x273   :  { %v2380_v34 = vpop.eup %2379  ;;  %v543_v35 = vmul.f32 %v2378_v33, %v2376_v32 }
 0x274   :  { %v542_v37 = vmul.f32 0.0, %v2380_v34 }
 0x276   :  { %v2880_v38 = vadd.f32 %v543_v35, %v542_v37 }
 0x278   :  { %2383 = vtanh.f32 %v2880_v38 }
 0x279   :  { %v2382_v40 = vpop.eup %2381 }
 0x282   :  { %v2384_v41 = vpop.eup %2383 }
 0x283   :  { %v2883_v43 = vmul.f32 %v2384_v41, %v2382_v40 }
 0x285   :  { %v547_v44 = vpack.c.bf16 %v2883_v43, %v2883_v43 }
 0x287   :  { %741 = vmatmul.mubr.bf16.vlgmr.msra.gmra.mrb[8].mxu0 %v547_v44  ;;  %782 = vmatmul.mubr.bf16.vlgmr.msra.gmra.mrb[8].mxu1 %v547_v44 }
 0x288   :  { %838 = vmatpush1.bf16.msra.mxu0 %v2762_v51  ;;  %879 = vmatpush1.bf16.msra.mxu1 %v2764_v52 }
 0x289   :  { %839 = vmatprep.subr.bf16.mxu0 %v2770_v53  ;;  %880 = vmatprep.subr.bf16.mxu1 %v2772_v54 }
 0x28a   :  { %869 = vmatprep.mubr.bf16.mxu0 %v2578_v0  ;;  %910 = vmatprep.mubr.bf16.mxu1 %v2578_v0 }
 0x28c   :  { %840 = vmatpush1.bf16.msra.mxu0 %v2774_v55  ;;  %881 = vmatpush1.bf16.msra.mxu1 %v2776_v56 }
 0x28d   :  { %841 = vmatprep.subr.bf16.mxu0 %v2782_v57  ;;  %882 = vmatprep.subr.bf16.mxu1 %v2784_v58 }
 0x290   :  { %842 = vmatpush1.bf16.msra.mxu0 %v2786_v59  ;;  %883 = vmatpush1.bf16.msra.mxu1 %v2788_v60 }
 0x291   :  { %843 = vmatprep.subr.bf16.mxu0 %v2794_v61  ;;  %884 = vmatprep.subr.bf16.mxu1 %v2796_v62 }
 0x294   :  { %844 = vmatpush1.bf16.msra.mxu0 %v2798_v63  ;;  %885 = vmatpush1.bf16.msra.mxu1 %v2800_v1 }
 0x295   :  { %845 = vmatprep.subr.bf16.mxu0 %v2806_v2  ;;  %886 = vmatprep.subr.bf16.mxu1 %v2808_v3 }
 0x298   :  { %846 = vmatpush1.bf16.msra.mxu0 %v2810_v4  ;;  %887 = vmatpush1.bf16.msra.mxu1 %v2812_v5 }
 0x299   :  { %847 = vmatprep.subr.bf16.mxu0 %v2814_v6  ;;  %888 = vmatprep.subr.bf16.mxu1 %v2818_v7 }
 0x29c   :  { %848 = vmatpush1.bf16.msra.mxu0 %v2822_v8  ;;  %889 = vmatpush1.bf16.msra.mxu1 %v2824_v9 }
 0x29d   :  { %849 = vmatprep.subr.bf16.mxu0 %v2828_v10  ;;  %890 = vmatprep.subr.bf16.mxu1 %v2830_v11 }
 0x2a0   :  { %850 = vmatpush1.bf16.msra.mxu0 %v2834_v12  ;;  %891 = vmatpush1.bf16.msra.mxu1 %v2836_v14 }
 0x2a1   :  { %851 = vmatprep.subr.bf16.mxu0 %v2840_v15  ;;  %892 = vmatprep.subr.bf16.mxu1 %v2842_v16 }
 0x2a4   :  { %852 = vmatpush1.bf16.msra.mxu0 %v2846_v17  ;;  %893 = vmatpush1.bf16.msra.mxu1 %v2848_v18 }
 0x2a5   :  { %966 = vmatprep.subr.bf16.mxu0 %v2758_v49  ;;  %1007 = vmatprep.subr.bf16.mxu1 %v2760_v50 }
 0x35a   :  { %v742_v46 = vpop.f32.mrb[8].mxu0  ;;  %v783_v47 = vpop.f32.mrb[8].mxu1 }
 0x35b   :  { %v794_v20 = vrot.slane %v742_v46, 6  ;;  %v744_v22 = vpop.f32.mrb[9].mxu0  ;;  %v785_v24 = vpop.f32.mrb[9].mxu1  ;;  %v796_v37 = vrot.slane %v783_v47, 6 }
 0x35c   :  { %v795_v27 = vrot.slane %v744_v22, 6  ;;  %v746_v28 = vpop.f32.mrb[10].mxu0  ;;  %v787_v29 = vpop.f32.mrb[10].mxu1  ;;  %v797_v35 = vrot.slane %v785_v24, 6  ;;  %v826_v24 = vrot.slane %v2880_v38, 6 }
 0x35d   :  { %v802_v30 = vadd.f32 %v794_v20, %v2860_v13  ;;  %v747_v26 = vpop.f32.mrb[11].mxu0  ;;  %v788_v31 = vpop.f32.mrb[11].mxu1  ;;  %v804_v41 = vadd.f32 %v796_v37, %v2870_v48 }
 0x35e   :  { %v803_v32 = vadd.f32 %v795_v27, %v2862_v39  ;;  %v805_v36 = vadd.f32 %v797_v35, %v2872_v21 }
 0x35f   :  { %v2106_v33 = vmul.f32 -1.442695, %v802_v30 }
 0x360   :  { %v2107_v34 = vmul.f32 -1.442695, %v803_v32  ;;  %v2108_v40 = vmul.f32 -1.442695, %v805_v36 }
 0x361   :  { %2385 = vpow2.f32 %v2106_v33 }
 0x362   :  { %2387 = vpow2.f32 %v2107_v34 }
 0x363   :  { %2389 = vpow2.f32 %v2108_v40 }
 0x364   :  { %2391 = vtanh.f32 %v804_v41 }
 0x36b   :  { %v2386_v44 = vpop.eup %2385 }
 0x36c   :  { %v2388_v46 = vpop.eup %2387  ;;  %v809_v22 = vadd.f32 1.0, %v2386_v44 }
 0x36d   :  { %v815_v20 = vadd.f32 1.0, %v2388_v46  ;;  %v2390_v27 = vpop.eup %2389 }
 0x36e   :  { %2393 = vrcp.f32 %v809_v22  ;;  %v2392_v28 = vpop.eup %2391  ;;  %v822_v31 = vadd.f32 1.0, %v2390_v27 }
 0x36f   :  { %2395 = vrcp.f32 %v815_v20 }
 0x370   :  { %2397 = vrcp.f32 %v822_v31 }
 0x378   :  { %v2394_v29 = vpop.eup %2393 }
 0x379   :  { %v2396_v30 = vpop.eup %2395  ;;  %v829_v26 = vmul.f32 %v2394_v29, %v2392_v28 }
 0x37a   :  { %v828_v47 = vmul.f32 %v2396_v30, %v826_v24  ;;  %v2398_v33 = vpop.eup %2397 }
 0x37c   :  { %v2926_v32 = vadd.f32 %v829_v26, %v828_v47 }
 0x37e   :  { %2399 = vtanh.f32 %v2926_v32 }
 0x388   :  { %v2400_v34 = vpop.eup %2399 }
 0x389   :  { %v2929_v35 = vmul.f32 %v2400_v34, %v2398_v33 }
 0x38b   :  { %v833_v36 = vpack.c.bf16 %v2929_v35, %v2929_v35 }
 0x38d   :  { %v835_v37 = vrot.slane %v833_v36, 1 }
 0x38f   :  { %870 = vmatmul.mubr.bf16.vlgmr.msra.gmra.mrb[12].mxu0 %v835_v37  ;;  %911 = vmatmul.mubr.bf16.vlgmr.msra.gmra.mrb[12].mxu1 %v835_v37 }
 0x390   :  { %967 = vmatpush1.bf16.msra.mxu0 %v2762_v51  ;;  %1008 = vmatpush1.bf16.msra.mxu1 %v2764_v52 }
 0x391   :  { %968 = vmatprep.subr.bf16.mxu0 %v2770_v53  ;;  %1009 = vmatprep.subr.bf16.mxu1 %v2772_v54 }
 0x392   :  { %998 = vmatprep.mubr.bf16.mxu0 %v2578_v0  ;;  %1039 = vmatprep.mubr.bf16.mxu1 %v2578_v0 }
 0x394   :  { %969 = vmatpush1.bf16.msra.mxu0 %v2774_v55  ;;  %1010 = vmatpush1.bf16.msra.mxu1 %v2776_v56 }
 0x395   :  { %970 = vmatprep.subr.bf16.mxu0 %v2782_v57  ;;  %1011 = vmatprep.subr.bf16.mxu1 %v2784_v58 }
 0x398   :  { %971 = vmatpush1.bf16.msra.mxu0 %v2786_v59  ;;  %1012 = vmatpush1.bf16.msra.mxu1 %v2788_v60 }
 0x399   :  { %972 = vmatprep.subr.bf16.mxu0 %v2794_v61  ;;  %1013 = vmatprep.subr.bf16.mxu1 %v2796_v62 }
 0x39c   :  { %973 = vmatpush1.bf16.msra.mxu0 %v2798_v63  ;;  %1014 = vmatpush1.bf16.msra.mxu1 %v2800_v1 }
 0x39d   :  { %974 = vmatprep.subr.bf16.mxu0 %v2806_v2  ;;  %1015 = vmatprep.subr.bf16.mxu1 %v2808_v3 }
 0x3a0   :  { %975 = vmatpush1.bf16.msra.mxu0 %v2810_v4  ;;  %1016 = vmatpush1.bf16.msra.mxu1 %v2812_v5 }
 0x3a1   :  { %976 = vmatprep.subr.bf16.mxu0 %v2814_v6  ;;  %1017 = vmatprep.subr.bf16.mxu1 %v2818_v7 }
 0x3a4   :  { %977 = vmatpush1.bf16.msra.mxu0 %v2822_v8  ;;  %1018 = vmatpush1.bf16.msra.mxu1 %v2824_v9 }
 0x3a5   :  { %978 = vmatprep.subr.bf16.mxu0 %v2828_v10  ;;  %1019 = vmatprep.subr.bf16.mxu1 %v2830_v11 }
 0x3a8   :  { %979 = vmatpush1.bf16.msra.mxu0 %v2834_v12  ;;  %1020 = vmatpush1.bf16.msra.mxu1 %v2836_v14 }
 0x3a9   :  { %980 = vmatprep.subr.bf16.mxu0 %v2840_v15  ;;  %1021 = vmatprep.subr.bf16.mxu1 %v2842_v16 }
 0x3ac   :  { %981 = vmatpush1.bf16.msra.mxu0 %v2846_v17  ;;  %1022 = vmatpush1.bf16.msra.mxu1 %v2848_v18 }
 0x3ad   :  { %1095 = vmatprep.subr.bf16.mxu0 %v2758_v49  ;;  %1136 = vmatprep.subr.bf16.mxu1 %v2760_v50 }
 0x462   :  { %v871_v38 = vpop.f32.mrb[12].mxu0  ;;  %v912_v40 = vpop.f32.mrb[12].mxu1 }
 0x463   :  { %v923_v41 = vrot.slane %v871_v38, 4  ;;  %v873_v44 = vpop.f32.mrb[13].mxu0  ;;  %v914_v46 = vpop.f32.mrb[13].mxu1  ;;  %v925_v34 = vrot.slane %v912_v40, 4 }
 0x464   :  { %v924_v22 = vrot.slane %v873_v44, 4  ;;  %v875_v20 = vpop.f32.mrb[14].mxu0  ;;  %v916_v27 = vpop.f32.mrb[14].mxu1  ;;  %v926_v47 = vrot.slane %v914_v46, 4  ;;  %v955_v46 = vrot.slane %v2926_v32, 6 }
 0x465   :  { %v931_v28 = vadd.f32 %v923_v41, %v2860_v13  ;;  %v876_v29 = vpop.f32.mrb[15].mxu0  ;;  %v917_v24 = vpop.f32.mrb[15].mxu1  ;;  %v933_v37 = vadd.f32 %v925_v34, %v2870_v48 }
 0x466   :  { %v932_v30 = vadd.f32 %v924_v22, %v2862_v39  ;;  %v934_v33 = vadd.f32 %v926_v47, %v2872_v21 }
 0x467   :  { %v2109_v26 = vmul.f32 -1.442695, %v931_v28 }
 0x468   :  { %v2110_v31 = vmul.f32 -1.442695, %v932_v30  ;;  %v2111_v36 = vmul.f32 -1.442695, %v934_v33 }
 0x469   :  { %2401 = vpow2.f32 %v2109_v26 }
 0x46a   :  { %2403 = vpow2.f32 %v2110_v31 }
 0x46b   :  { %2405 = vpow2.f32 %v2111_v36 }
 0x46c   :  { %2407 = vtanh.f32 %v933_v37 }
 0x473   :  { %v2402_v38 = vpop.eup %2401 }
 0x474   :  { %v2404_v44 = vpop.eup %2403  ;;  %v938_v20 = vadd.f32 1.0, %v2402_v38 }
 0x475   :  { %v944_v41 = vadd.f32 1.0, %v2404_v44  ;;  %v2406_v22 = vpop.eup %2405 }
 0x476   :  { %2409 = vrcp.f32 %v938_v20  ;;  %v2408_v27 = vpop.eup %2407  ;;  %v951_v30 = vadd.f32 1.0, %v2406_v22 }
 0x477   :  { %2411 = vrcp.f32 %v944_v41 }
 0x478   :  { %2413 = vrcp.f32 %v951_v30 }
 0x480   :  { %v2410_v28 = vpop.eup %2409 }
 0x481   :  { %v2412_v29 = vpop.eup %2411  ;;  %v958_v24 = vmul.f32 %v2410_v28, %v2408_v27 }
 0x482   :  { %v957_v40 = vmul.f32 %v2412_v29, %v955_v46  ;;  %v2414_v31 = vpop.eup %2413 }
 0x484   :  { %v2972_v26 = vadd.f32 %v958_v24, %v957_v40 }
 0x486   :  { %2415 = vtanh.f32 %v2972_v26 }
 0x490   :  { %v2416_v47 = vpop.eup %2415 }
 0x491   :  { %v2975_v33 = vmul.f32 %v2416_v47, %v2414_v31 }
 0x493   :  { %v962_v34 = vpack.c.bf16 %v2975_v33, %v2975_v33 }
 0x495   :  { %v964_v36 = vrot.slane %v962_v34, 2 }
 0x497   :  { %999 = vmatmul.mubr.bf16.vlgmr.msra.gmra.mrb[16].mxu0 %v964_v36  ;;  %1040 = vmatmul.mubr.bf16.vlgmr.msra.gmra.mrb[16].mxu1 %v964_v36 }
 0x498   :  { %1096 = vmatpush1.bf16.msra.mxu0 %v2762_v51  ;;  %1137 = vmatpush1.bf16.msra.mxu1 %v2764_v52 }
 0x499   :  { %1097 = vmatprep.subr.bf16.mxu0 %v2770_v53  ;;  %1138 = vmatprep.subr.bf16.mxu1 %v2772_v54 }
 0x49a   :  { %1127 = vmatprep.mubr.bf16.mxu0 %v2578_v0  ;;  %1168 = vmatprep.mubr.bf16.mxu1 %v2578_v0 }
 0x49c   :  { %1098 = vmatpush1.bf16.msra.mxu0 %v2774_v55  ;;  %1139 = vmatpush1.bf16.msra.mxu1 %v2776_v56 }
 0x49d   :  { %1099 = vmatprep.subr.bf16.mxu0 %v2782_v57  ;;  %1140 = vmatprep.subr.bf16.mxu1 %v2784_v58 }
 0x4a0   :  { %1100 = vmatpush1.bf16.msra.mxu0 %v2786_v59  ;;  %1141 = vmatpush1.bf16.msra.mxu1 %v2788_v60 }
 0x4a1   :  { %1101 = vmatprep.subr.bf16.mxu0 %v2794_v61  ;;  %1142 = vmatprep.subr.bf16.mxu1 %v2796_v62 }
 0x4a4   :  { %1102 = vmatpush1.bf16.msra.mxu0 %v2798_v63  ;;  %1143 = vmatpush1.bf16.msra.mxu1 %v2800_v1 }
 0x4a5   :  { %1103 = vmatprep.subr.bf16.mxu0 %v2806_v2  ;;  %1144 = vmatprep.subr.bf16.mxu1 %v2808_v3 }
 0x4a8   :  { %1104 = vmatpush1.bf16.msra.mxu0 %v2810_v4  ;;  %1145 = vmatpush1.bf16.msra.mxu1 %v2812_v5 }
 0x4a9   :  { %1105 = vmatprep.subr.bf16.mxu0 %v2814_v6  ;;  %1146 = vmatprep.subr.bf16.mxu1 %v2818_v7 }
 0x4ac   :  { %1106 = vmatpush1.bf16.msra.mxu0 %v2822_v8  ;;  %1147 = vmatpush1.bf16.msra.mxu1 %v2824_v9 }
 0x4ad   :  { %1107 = vmatprep.subr.bf16.mxu0 %v2828_v10  ;;  %1148 = vmatprep.subr.bf16.mxu1 %v2830_v11 }
 0x4b0   :  { %1108 = vmatpush1.bf16.msra.mxu0 %v2834_v12  ;;  %1149 = vmatpush1.bf16.msra.mxu1 %v2836_v14 }
 0x4b1   :  { %1109 = vmatprep.subr.bf16.mxu0 %v2840_v15  ;;  %1150 = vmatprep.subr.bf16.mxu1 %v2842_v16 }
 0x4b4   :  { %1110 = vmatpush1.bf16.msra.mxu0 %v2846_v17  ;;  %1151 = vmatpush1.bf16.msra.mxu1 %v2848_v18 }
 0x4b5   :  { %1209 = vmatprep.subr.bf16.mxu0 %v2758_v49  ;;  %1250 = vmatprep.subr.bf16.mxu1 %v2760_v50 }
 0x56a   :  { %v1000_v32 = vpop.f32.mrb[16].mxu0  ;;  %v1041_v37 = vpop.f32.mrb[16].mxu1 }
 0x56b   :  { %v1052_v38 = vrot.slane %v1000_v32, 2  ;;  %v1002_v44 = vpop.f32.mrb[17].mxu0  ;;  %v1043_v20 = vpop.f32.mrb[17].mxu1  ;;  %v1054_v34 = vrot.slane %v1041_v37, 2 }
 0x56c   :  { %v1053_v41 = vrot.slane %v1002_v44, 2  ;;  %v1004_v22 = vpop.f32.mrb[18].mxu0  ;;  %v1045_v27 = vpop.f32.mrb[18].mxu1  ;;  %v1055_v31 = vrot.slane %v1043_v20, 2  ;;  %v1084_v20 = vrot.slane %v2972_v26, 6 }
 0x56d   :  { %v1060_v28 = vadd.f32 %v1052_v38, %v2860_v13  ;;  %v1005_v46 = vpop.f32.mrb[19].mxu0  ;;  %v1046_v29 = vpop.f32.mrb[19].mxu1  ;;  %v1062_v32 = vadd.f32 %v1054_v34, %v2870_v48 }
 0x56e   :  { %v1061_v24 = vadd.f32 %v1053_v41, %v2862_v39  ;;  %v1063_v47 = vadd.f32 %v1055_v31, %v2872_v21 }
 0x56f   :  { %v2112_v30 = vmul.f32 -1.442695, %v1060_v28 }
 0x570   :  { %v2113_v40 = vmul.f32 -1.442695, %v1061_v24  ;;  %v2114_v36 = vmul.f32 -1.442695, %v1063_v47 }
 0x571   :  { %2417 = vpow2.f32 %v2112_v30 }
 0x572   :  { %2419 = vpow2.f32 %v2113_v40 }
 0x573   :  { %2421 = vpow2.f32 %v2114_v36 }
 0x574   :  { %2423 = vtanh.f32 %v1062_v32 }
 0x57b   :  { %v2418_v44 = vpop.eup %2417 }
 0x57c   :  { %v2420_v22 = vpop.eup %2419  ;;  %v1067_v27 = vadd.f32 1.0, %v2418_v44 }
 0x57d   :  { %v1073_v13 = vadd.f32 1.0, %v2420_v22  ;;  %v2422_v39 = vpop.eup %2421 }
 0x57e   :  { %2425 = vrcp.f32 %v1067_v27  ;;  %v2424_v38 = vpop.eup %2423  ;;  %v1080_v21 = vadd.f32 1.0, %v2422_v39 }
 0x57f   :  { %2427 = vrcp.f32 %v1073_v13 }
 0x580   :  { %2429 = vrcp.f32 %v1080_v21 }
 0x588   :  { %v2426_v41 = vpop.eup %2425 }
 0x589   :  { %v2428_v28 = vpop.eup %2427  ;;  %v1087_v46 = vmul.f32 %v2426_v41, %v2424_v38 }
 0x58a   :  { %v1086_v37 = vmul.f32 %v2428_v28, %v1084_v20  ;;  %v2430_v48 = vpop.eup %2429 }
 0x58c   :  { %v3018_v29 = vadd.f32 %v1087_v46, %v1086_v37 }
 0x58e   :  { %2431 = vtanh.f32 %v3018_v29 }
 0x598   :  { %v2432_v24 = vpop.eup %2431 }
 0x599   :  { %v3021_v30 = vmul.f32 %v2432_v24, %v2430_v48 }
 0x59b   :  { %v1091_v40 = vpack.c.bf16 %v3021_v30, %v3021_v30 }
 0x59d   :  { %v1093_v31 = vrot.slane %v1091_v40, 3 }
 0x59f   :  { %1128 = vmatmul.mubr.bf16.vlgmr.msra.gmra.mrb[20].mxu0 %v1093_v31  ;;  %1169 = vmatmul.mubr.bf16.vlgmr.msra.gmra.mrb[20].mxu1 %v1093_v31 }
 0x5a0   :  { %1210 = vmatpush1.bf16.msra.mxu0 %v2762_v51  ;;  %1251 = vmatpush1.bf16.msra.mxu1 %v2764_v52 }
 0x5a1   :  { %1211 = vmatprep.subr.bf16.mxu0 %v2770_v53  ;;  %1252 = vmatprep.subr.bf16.mxu1 %v2772_v54 }
 0x5a2   :  { %1241 = vmatprep.mubr.bf16.mxu0 %v2578_v0  ;;  %1282 = vmatprep.mubr.bf16.mxu1 %v2578_v0 }
 0x5a4   :  { %1212 = vmatpush1.bf16.msra.mxu0 %v2774_v55  ;;  %1253 = vmatpush1.bf16.msra.mxu1 %v2776_v56 }
 0x5a5   :  { %1213 = vmatprep.subr.bf16.mxu0 %v2782_v57  ;;  %1254 = vmatprep.subr.bf16.mxu1 %v2784_v58 }
 0x5a8   :  { %1214 = vmatpush1.bf16.msra.mxu0 %v2786_v59  ;;  %1255 = vmatpush1.bf16.msra.mxu1 %v2788_v60 }
 0x5a9   :  { %1215 = vmatprep.subr.bf16.mxu0 %v2794_v61  ;;  %1256 = vmatprep.subr.bf16.mxu1 %v2796_v62 }
 0x5ac   :  { %1216 = vmatpush1.bf16.msra.mxu0 %v2798_v63  ;;  %1257 = vmatpush1.bf16.msra.mxu1 %v2800_v1 }
 0x5ad   :  { %1217 = vmatprep.subr.bf16.mxu0 %v2806_v2  ;;  %1258 = vmatprep.subr.bf16.mxu1 %v2808_v3 }
 0x5b0   :  { %1218 = vmatpush1.bf16.msra.mxu0 %v2810_v4  ;;  %1259 = vmatpush1.bf16.msra.mxu1 %v2812_v5 }
 0x5b1   :  { %1219 = vmatprep.subr.bf16.mxu0 %v2814_v6  ;;  %1260 = vmatprep.subr.bf16.mxu1 %v2818_v7 }
 0x5b4   :  { %1220 = vmatpush1.bf16.msra.mxu0 %v2822_v8  ;;  %1261 = vmatpush1.bf16.msra.mxu1 %v2824_v9 }
 0x5b5   :  { %1221 = vmatprep.subr.bf16.mxu0 %v2828_v10  ;;  %1262 = vmatprep.subr.bf16.mxu1 %v2830_v11 }
 0x5b8   :  { %1222 = vmatpush1.bf16.msra.mxu0 %v2834_v12  ;;  %1263 = vmatpush1.bf16.msra.mxu1 %v2836_v14 }
 0x5b9   :  { %1223 = vmatprep.subr.bf16.mxu0 %v2840_v15  ;;  %1264 = vmatprep.subr.bf16.mxu1 %v2842_v16 }
 0x5bc   :  { %1224 = vmatpush1.bf16.msra.mxu0 %v2846_v17  ;;  %1265 = vmatpush1.bf16.msra.mxu1 %v2848_v18 }
 0x5bd   :  { %1338 = vmatprep.subr.bf16.mxu0 %v2758_v49  ;;  %1379 = vmatprep.subr.bf16.mxu1 %v2760_v50 }
 0x672   :  { %v1129_v26 = vpop.f32.mrb[20].mxu0  ;;  %v1170_v47 = vpop.f32.mrb[20].mxu1 }
 0x673   :  { %v1177_v34 = vadd.f32 %v1129_v26, %v2865_v42  ;;  %v1131_v36 = vpop.f32.mrb[21].mxu0  ;;  %v1172_v32 = vpop.f32.mrb[21].mxu1  ;;  %v1179_v46 = vadd.f32 %v1170_v47, %v2874_v23 }
 0x674   :  { %v1178_v44 = vadd.f32 %v1131_v36, %v2868_v45  ;;  %v1133_v22 = vpop.f32.mrb[22].mxu0  ;;  %v1174_v27 = vpop.f32.mrb[22].mxu1  ;;  %v1180_v20 = vadd.f32 %v1172_v32, %v2876_v25 }
 0x675   :  { %v2115_v13 = vmul.f32 -1.442695, %v1177_v34  ;;  %v1134_v39 = vpop.f32.mrb[23].mxu0  ;;  %v1175_v38 = vpop.f32.mrb[23].mxu1  ;;  %v1201_v34 = vrot.slane %v3018_v29, 6 }
 0x676   :  { %v2116_v41 = vmul.f32 -1.442695, %v1178_v44  ;;  %v2117_v28 = vmul.f32 -1.442695, %v1180_v20 }
 0x677   :  { %2433 = vpow2.f32 %v2115_v13 }
 0x678   :  { %2435 = vpow2.f32 %v2116_v41 }
 0x679   :  { %2437 = vpow2.f32 %v2117_v28 }
 0x67a   :  { %2439 = vtanh.f32 %v1179_v46 }
 0x681   :  { %v2434_v21 = vpop.eup %2433 }
 0x682   :  { %v2436_v37 = vpop.eup %2435  ;;  %v1184_v48 = vadd.f32 1.0, %v2434_v21 }
 0x683   :  { %v1190_v24 = vadd.f32 1.0, %v2436_v37  ;;  %v2438_v40 = vpop.eup %2437  ;;  %v1614_v37 = vrot.slane %v2975_v33, 2 }
 0x684   :  { %2441 = vrcp.f32 %v1184_v48  ;;  %v2440_v31 = vpop.eup %2439  ;;  %v1197_v22 = vadd.f32 1.0, %v2438_v40  ;;  %v1610_v48 = vrot.slane %v3021_v30, 6 }
 0x685   :  { %2443 = vrcp.f32 %v1190_v24 }
 0x686   :  { %2445 = vrcp.f32 %v1197_v22  ;;  %v2502_v22 = vld [vmem:[#allocation2 + $0x8] ss:$16 sps:$4 sm:$0xff]  }
 0x68e   :  { %v2442_v26 = vpop.eup %2441 }
 0x68f   :  { %v2444_v36 = vpop.eup %2443  ;;  %v1204_v44 = vmul.f32 %v2442_v26, %v2440_v31 }
 0x690   :  { %v1203_v32 = vmul.f32 %v2444_v36, %v1201_v34  ;;  %v2446_v47 = vpop.eup %2445 }
 0x692   :  { %v3064_v27 = vadd.f32 %v1204_v44, %v1203_v32  ;;  %v2501_v44 = vld [vmem:[#allocation2] ss:$16 sps:$4 sm:$0xff]   ;;  %v2503_v32 = vld [vmem:[#allocation2 + $0x24] ss:$16 sps:$4 sm:$0xff]  }
 0x694   :  { %2447 = vtanh.f32 %v3064_v27 }
 0x69e   :  { %v2448_v13 = vpop.eup %2447 }
 0x69f   :  { %v3067_v39 = vmul.f32 %v2448_v13, %v2446_v47  ;;  %v2505_v47 = vld [vmem:[#allocation2 + $0x20] ss:$16 sps:$4 sm:$0xff]   ;;  %v2506_v13 = vld [vmem:[#allocation2 + $0x28] ss:$16 sps:$4 sm:$0xff]  }
 0x6a1   :  { %v1208_v38 = vpack.c.bf16 %v3067_v39, %v3067_v39  ;;  %v1612_v31 = vsel %vm1595_vm7, %v3067_v39, %v1610_v48 }
 0x6a3   :  { %1242 = vmatmul.mubr.bf16.vlgmr.msra.gmra.mrb[24].mxu0 %v1208_v38  ;;  %1283 = vmatmul.mubr.bf16.vlgmr.msra.gmra.mrb[24].mxu1 %v1208_v38  ;;  %v2507_v38 = vld [vmem:[#allocation2 + $0x44] ss:$16 sps:$4 sm:$0xff]  }
 0x6a4   :  { %1339 = vmatpush1.bf16.msra.mxu0 %v2762_v51  ;;  %1380 = vmatpush1.bf16.msra.mxu1 %v2764_v52 }
 0x6a5   :  { %1340 = vmatprep.subr.bf16.mxu0 %v2770_v53  ;;  %1381 = vmatprep.subr.bf16.mxu1 %v2772_v54 }
 0x6a6   :  { %1370 = vmatprep.mubr.bf16.mxu0 %v2578_v0  ;;  %1411 = vmatprep.mubr.bf16.mxu1 %v2578_v0 }
 0x6a8   :  { %1341 = vmatpush1.bf16.msra.mxu0 %v2774_v55  ;;  %1382 = vmatpush1.bf16.msra.mxu1 %v2776_v56 }
 0x6a9   :  { %1342 = vmatprep.subr.bf16.mxu0 %v2782_v57  ;;  %1383 = vmatprep.subr.bf16.mxu1 %v2784_v58 }
 0x6ac   :  { %1343 = vmatpush1.bf16.msra.mxu0 %v2786_v59  ;;  %1384 = vmatpush1.bf16.msra.mxu1 %v2788_v60 }
 0x6ad   :  { %1344 = vmatprep.subr.bf16.mxu0 %v2794_v61  ;;  %1385 = vmatprep.subr.bf16.mxu1 %v2796_v62 }
 0x6b0   :  { %1345 = vmatpush1.bf16.msra.mxu0 %v2798_v63  ;;  %1386 = vmatpush1.bf16.msra.mxu1 %v2800_v1 }
 0x6b1   :  { %1346 = vmatprep.subr.bf16.mxu0 %v2806_v2  ;;  %1387 = vmatprep.subr.bf16.mxu1 %v2808_v3 }
 0x6b4   :  { %1347 = vmatpush1.bf16.msra.mxu0 %v2810_v4  ;;  %1388 = vmatpush1.bf16.msra.mxu1 %v2812_v5 }
 0x6b5   :  { %1348 = vmatprep.subr.bf16.mxu0 %v2814_v6  ;;  %1389 = vmatprep.subr.bf16.mxu1 %v2818_v7 }
 0x6b8   :  { %1349 = vmatpush1.bf16.msra.mxu0 %v2822_v8  ;;  %1390 = vmatpush1.bf16.msra.mxu1 %v2824_v9 }
 0x6b9   :  { %1350 = vmatprep.subr.bf16.mxu0 %v2828_v10  ;;  %1391 = vmatprep.subr.bf16.mxu1 %v2830_v11 }
 0x6bc   :  { %1351 = vmatpush1.bf16.msra.mxu0 %v2834_v12  ;;  %1392 = vmatpush1.bf16.msra.mxu1 %v2836_v14  ;;  %v1327_v12 = vrot.slane %v3064_v27, 6  ;;  %v2504_v27 = vld [vmem:[#allocation2 + $0x2c] ss:$16 sps:$4 sm:$0xff]  }
 0x6bd   :  { %1352 = vmatprep.subr.bf16.mxu0 %v2840_v15  ;;  %1393 = vmatprep.subr.bf16.mxu1 %v2842_v16 }
 0x6c0   :  { %1353 = vmatpush1.bf16.msra.mxu0 %v2846_v17  ;;  %1394 = vmatpush1.bf16.msra.mxu1 %v2848_v18 }
 0x6c1   :  { %1467 = vmatprep.subr.bf16.mxu0 %v2758_v49  ;;  %1508 = vmatprep.subr.bf16.mxu1 %v2760_v50 }
 0x776   :  { %v1243_v51 = vpop.f32.mrb[24].mxu0  ;;  %v1284_v52 = vpop.f32.mrb[24].mxu1 }
 0x777   :  { %v1295_v53 = vrot.slane %v1243_v51, 6  ;;  %v1245_v54 = vpop.f32.mrb[25].mxu0  ;;  %v1286_v55 = vpop.f32.mrb[25].mxu1  ;;  %v1297_v50 = vrot.slane %v1284_v52, 6  ;;  %v2508_v51 = vld [vmem:[#allocation2 + $0x4c] ss:$16 sps:$4 sm:$0xff]  }
 0x778   :  { %v1296_v56 = vrot.slane %v1245_v54, 6  ;;  %v1247_v57 = vpop.f32.mrb[26].mxu0  ;;  %v1288_v58 = vpop.f32.mrb[26].mxu1  ;;  %v1298_v2 = vrot.slane %v1286_v55, 6  ;;  %v2509_v52 = vld [vmem:[#allocation2 + $0x40] ss:$16 sps:$4 sm:$0xff]  }
 0x779   :  { %v1303_v59 = vadd.f32 %v1295_v53, %v2865_v42  ;;  %v1248_v60 = vpop.f32.mrb[27].mxu0  ;;  %v1289_v61 = vpop.f32.mrb[27].mxu1  ;;  %v1305_v4 = vadd.f32 %v1297_v50, %v2874_v23  ;;  %v2510_v53 = vld [vmem:[#allocation2 + $0x48] ss:$16 sps:$4 sm:$0xff]   ;;  %v2511_v54 = vld [vmem:[#allocation2 + $0x64] ss:$16 sps:$4 sm:$0xff]  }
 0x77a   :  { %v1304_v62 = vadd.f32 %v1296_v56, %v2868_v45  ;;  %v1306_v49 = vadd.f32 %v1298_v2, %v2876_v25  ;;  %v2512_v55 = vld [vmem:[#allocation2 + $0x6c] ss:$16 sps:$4 sm:$0xff]   ;;  %v2513_v56 = vld [vmem:[#allocation2 + $0x60] ss:$16 sps:$4 sm:$0xff]   ;;  %v2514_v57 = vld [vmem:[#allocation2 + $0x68] ss:$16 sps:$4 sm:$0xff]  }
 0x77b   :  { %v2118_v63 = vmul.f32 -1.442695, %v1303_v59  ;;  %v2516_v58 = vld [vmem:[#allocation2 + $0x8c] ss:$16 sps:$4 sm:$0xff]   ;;  %v2517_v59 = vld [vmem:[#allocation2 + $0x80] ss:$16 sps:$4 sm:$0xff]  }
 0x77c   :  { %v2119_v1 = vmul.f32 -1.442695, %v1304_v62  ;;  %v2120_v3 = vmul.f32 -1.442695, %v1306_v49  ;;  %v2518_v60 = vld [vmem:[#allocation2 + $0x88] ss:$16 sps:$4 sm:$0xff]  }
 0x77d   :  { %2449 = vpow2.f32 %v2118_v63  ;;  %v2519_v61 = vld [vmem:[#allocation2 + $0xa4] ss:$16 sps:$4 sm:$0xff]   ;;  %v2520_v62 = vld [vmem:[#allocation2 + $0xac] ss:$16 sps:$4 sm:$0xff]   ;;  %v2521_v63 = vld [vmem:[#allocation2 + $0xa0] ss:$16 sps:$4 sm:$0xff]  }
 0x77e   :  { %2451 = vpow2.f32 %v2119_v1  ;;  %v2522_v1 = vld [vmem:[#allocation2 + $0xa8] ss:$16 sps:$4 sm:$0xff]   ;;  %v2523_v2 = vld [vmem:[#allocation2 + $0xc4] ss:$16 sps:$4 sm:$0xff]   ;;  %v2524_v49 = vld [vmem:[#allocation2 + $0xcc] ss:$16 sps:$4 sm:$0xff]  }
 0x77f   :  { %2453 = vpow2.f32 %v2120_v3  ;;  %v2525_v50 = vld [vmem:[#allocation2 + $0xc0] ss:$16 sps:$4 sm:$0xff]   ;;  %v2526_v3 = vld [vmem:[#allocation2 + $0xc8] ss:$16 sps:$4 sm:$0xff]  }
 0x780   :  { %2455 = vtanh.f32 %v1305_v4 }
 0x787   :  { %v2450_v5 = vpop.eup %2449 }
 0x788   :  { %v2452_v6 = vpop.eup %2451  ;;  %v1310_v7 = vadd.f32 1.0, %v2450_v5 }
 0x789   :  { %v1316_v8 = vadd.f32 1.0, %v2452_v6  ;;  %v2454_v9 = vpop.eup %2453 }
 0x78a   :  { %2457 = vrcp.f32 %v1310_v7  ;;  %v2456_v10 = vpop.eup %2455  ;;  %v1323_v41 = vadd.f32 1.0, %v2454_v9 }
 0x78b   :  { %2459 = vrcp.f32 %v1316_v8 }
 0x78c   :  { %2461 = vrcp.f32 %v1323_v41 }
 0x794   :  { %v2458_v11 = vpop.eup %2457 }
 0x795   :  { %v2460_v14 = vpop.eup %2459  ;;  %v1330_v29 = vmul.f32 %v2458_v11, %v2456_v10 }
 0x796   :  { %v1329_v20 = vmul.f32 %v2460_v14, %v1327_v12  ;;  %v2462_v46 = vpop.eup %2461 }
 0x798   :  { %v3110_v28 = vadd.f32 %v1330_v29, %v1329_v20 }
 0x79a   :  { %2463 = vtanh.f32 %v3110_v28 }
 0x7a4   :  { %v2464_v21 = vpop.eup %2463 }
 0x7a5   :  { %v3115_v24 = vmul.f32 %v2464_v21, %v2462_v46 }
 0x7a7   :  { %v1334_v40 = vpack.c.bf16 %v3115_v24, %v3115_v24  ;;  %v1616_v26 = vsel %vm1595_vm7, %v3115_v24, %v1614_v37 }
 0x7a8   :  { %v3124_v34 = vsel %vm1625_vm8, %v1612_v31, %v1616_v26 }
 0x7a9   :  { %v1336_v36 = vrot.slane %v1334_v40, 1 }
 0x7ab   :  { %1371 = vmatmul.mubr.bf16.vlgmr.msra.gmra.mrb[28].mxu0 %v1336_v36  ;;  %1412 = vmatmul.mubr.bf16.vlgmr.msra.gmra.mrb[28].mxu1 %v1336_v36 }
 0x7ac   :  { %1468 = vmatpush1.bf16.msra.mxu0 %v2501_v44  ;;  %1509 = vmatpush1.bf16.msra.mxu1 %v2502_v22  ;;  %v1456_v22 = vrot.slane %v3110_v28, 6 }
 0x7ad   :  { %1469 = vmatprep.subr.bf16.mxu0 %v2503_v32  ;;  %1510 = vmatprep.subr.bf16.mxu1 %v2504_v27 }
 0x7ae   :  { %1499 = vmatprep.mubr.bf16.mxu0 %v2578_v0  ;;  %1540 = vmatprep.mubr.bf16.mxu1 %v2578_v0  ;;  %v2515_v0 = vld [vmem:[#allocation2 + $0x84] ss:$16 sps:$4 sm:$0xff]  }
 0x7b0   :  { %1470 = vmatpush1.bf16.msra.mxu0 %v2505_v47  ;;  %1511 = vmatpush1.bf16.msra.mxu1 %v2506_v13 }
 0x7b1   :  { %1471 = vmatprep.subr.bf16.mxu0 %v2507_v38  ;;  %1512 = vmatprep.subr.bf16.mxu1 %v2508_v51 }
 0x7b4   :  { %1472 = vmatpush1.bf16.msra.mxu0 %v2509_v52  ;;  %1513 = vmatpush1.bf16.msra.mxu1 %v2510_v53  ;;  %v1618_v53 = vrot.slane %v2929_v35, 6 }
 0x7b5   :  { %1473 = vmatprep.subr.bf16.mxu0 %v2511_v54  ;;  %1514 = vmatprep.subr.bf16.mxu1 %v2512_v55 }
 0x7b8   :  { %1474 = vmatpush1.bf16.msra.mxu0 %v2513_v56  ;;  %1515 = vmatpush1.bf16.msra.mxu1 %v2514_v57 }
 0x7b9   :  { %1475 = vmatprep.subr.bf16.mxu0 %v2515_v0  ;;  %1516 = vmatprep.subr.bf16.mxu1 %v2516_v58  ;;  %v2349_v0 = vld [vmem:[%s3301_s6] sm:$0xff]   ;;  %v2350_v58 = vld [vmem:[%s3301_s6 + $0x8] sm:$0xff]  }
 0x7bc   :  { %1476 = vmatpush1.bf16.msra.mxu0 %v2517_v59  ;;  %1517 = vmatpush1.bf16.msra.mxu1 %v2518_v60  ;;  %v2352_v59 = vld [vmem:[%s3301_s6 + $0x18] sm:$0xff]   ;;  %v2353_v60 = vld [vmem:[%s3301_s6 + $0x20] sm:$0xff]  }
 0x7bd   :  { %1477 = vmatprep.subr.bf16.mxu0 %v2519_v61  ;;  %1518 = vmatprep.subr.bf16.mxu1 %v2520_v62  ;;  %v2354_v61 = vld [vmem:[%s3301_s6 + $0x28] sm:$0xff]   ;;  %v2355_v62 = vld [vmem:[%s3301_s6 + $0x30] sm:$0xff]  }
 0x7c0   :  { %1478 = vmatpush1.bf16.msra.mxu0 %v2521_v63  ;;  %1519 = vmatpush1.bf16.msra.mxu1 %v2522_v1  ;;  %v2356_v63 = vld [vmem:[%s3301_s6 + $0x38] sm:$0xff]  }
 0x7c1   :  { %1479 = vmatprep.subr.bf16.mxu0 %v2523_v2  ;;  %1520 = vmatprep.subr.bf16.mxu1 %v2524_v49 }
 0x7c4   :  { %1480 = vmatpush1.bf16.msra.mxu0 %v2525_v50  ;;  %1521 = vmatpush1.bf16.msra.mxu1 %v2526_v3 }
 0x7c5   :  { %1481 = vmatprep.subr.bf16.mxu0 %v2840_v15  ;;  %1522 = vmatprep.subr.bf16.mxu1 %v2842_v16 }
 0x7c8   :  { %1482 = vmatpush1.bf16.msra.mxu0 %v2846_v17  ;;  %1523 = vmatpush1.bf16.msra.mxu1 %v2848_v18 }
 0x7c9   :  { %2196 = vmatprep.subr.bf16.mxu0 %v2579_v19  ;;  %2216 = vmatprep.subr.bf16.mxu1 %v2579_v19 }
 0x87e   :  { %v1372_v4 = vpop.f32.mrb[28].mxu0  ;;  %v1413_v5 = vpop.f32.mrb[28].mxu1 }
 0x87f   :  { %v1424_v6 = vrot.slane %v1372_v4, 4  ;;  %v1374_v7 = vpop.f32.mrb[29].mxu0  ;;  %v1415_v8 = vpop.f32.mrb[29].mxu1  ;;  %v1426_v20 = vrot.slane %v1413_v5, 4 }
 0x880   :  { %v1425_v9 = vrot.slane %v1374_v7, 4  ;;  %v1376_v10 = vpop.f32.mrb[30].mxu0  ;;  %v1417_v11 = vpop.f32.mrb[30].mxu1  ;;  %v1427_v29 = vrot.slane %v1415_v8, 4 }
 0x881   :  { %v1432_v15 = vadd.f32 %v1424_v6, %v2865_v42  ;;  %v1377_v12 = vpop.f32.mrb[31].mxu0  ;;  %v1418_v16 = vpop.f32.mrb[31].mxu1  ;;  %v1434_v21 = vadd.f32 %v1426_v20, %v2874_v23 }
 0x882   :  { %v1433_v17 = vadd.f32 %v1425_v9, %v2868_v45  ;;  %v1435_v41 = vadd.f32 %v1427_v29, %v2876_v25 }
 0x883   :  { %v2121_v14 = vmul.f32 -1.442695, %v1432_v15 }
 0x884   :  { %v2122_v18 = vmul.f32 -1.442695, %v1433_v17  ;;  %v2123_v46 = vmul.f32 -1.442695, %v1435_v41 }
 0x885   :  { %2465 = vpow2.f32 %v2121_v14 }
 0x886   :  { %2467 = vpow2.f32 %v2122_v18 }
 0x887   :  { %2469 = vpow2.f32 %v2123_v46 }
 0x888   :  { %2471 = vtanh.f32 %v1434_v21 }
 0x88f   :  { %v2466_v37 = vpop.eup %2465 }
 0x890   :  { %v2468_v48 = vpop.eup %2467  ;;  %v1439_v40 = vadd.f32 1.0, %v2466_v37 }
 0x891   :  { %v1445_v31 = vadd.f32 1.0, %v2468_v48  ;;  %v2470_v26 = vpop.eup %2469 }
 0x892   :  { %2473 = vrcp.f32 %v1439_v40  ;;  %v2472_v36 = vpop.eup %2471  ;;  %v1452_v47 = vadd.f32 1.0, %v2470_v26 }
 0x893   :  { %2475 = vrcp.f32 %v1445_v31 }
 0x894   :  { %2477 = vrcp.f32 %v1452_v47 }
 0x89c   :  { %v2474_v44 = vpop.eup %2473 }
 0x89d   :  { %v2476_v32 = vpop.eup %2475  ;;  %v1459_v27 = vmul.f32 %v2474_v44, %v2472_v36 }
 0x89e   :  { %v1458_v13 = vmul.f32 %v2476_v32, %v1456_v22  ;;  %v2478_v51 = vpop.eup %2477  ;;  %v1622_v32 = vrot.slane %v2883_v43, 2 }
 0x8a0   :  { %v3139_v38 = vadd.f32 %v1459_v27, %v1458_v13  ;;  %v1602_v27 = vrot.slane %v3115_v24, 6  ;;  %v1606_v13 = vrot.slane %v3067_v39, 2 }
 0x8a2   :  { %2479 = vtanh.f32 %v3139_v38  ;;  %v1585_v37 = vrot.slane %v3139_v38, 6  ;;  %v1608_v24 = vsel %vm1595_vm7, %v3021_v30, %v1606_v13 }
 0x8ac   :  { %v2480_v52 = vpop.eup %2479 }
 0x8ad   :  { %v3143_v54 = vmul.f32 %v2480_v52, %v2478_v51 }
 0x8af   :  { %v1463_v55 = vpack.c.bf16 %v3143_v54, %v3143_v54  ;;  %v1620_v28 = vsel %vm1595_vm7, %v3143_v54, %v1618_v53  ;;  %v1598_v44 = vrot.slane %v3143_v54, 2  ;;  %v1604_v54 = vsel %vm1595_vm7, %v2975_v33, %v1602_v27 }
 0x8b0   :  { %v3151_v56 = vsel %vm1627_vm9, %v3124_v34, %v1620_v28  ;;  %v2351_v34 = vld [vmem:[%s3301_s6 + $0x10] sm:$0xff]  }
 0x8b1   :  { %v1465_v57 = vrot.slane %v1463_v55, 2  ;;  %v1600_v53 = vsel %vm1595_vm7, %v2929_v35, %v1598_v44 }
 0x8b3   :  { %1500 = vmatmul.mubr.bf16.vlgmr.msra.gmra.mrb[32].mxu0 %v1465_v57  ;;  %1541 = vmatmul.mubr.bf16.vlgmr.msra.gmra.mrb[32].mxu1 %v1465_v57 }
 0x8b4   :  { %2197 = vmatpush3.bf16.msra.mxu0 %v2349_v0  ;;  %2212 = vmatprep.mubr.msk.bf16.mxu0 %vm2580_vm10, %v2579_v19 }
 0x8b5   :  { %2198 = vmatprep.subr.bf16.mxu0 %v2579_v19  ;;  %2220 = vmatprep.mubr.msk.bf16.mxu1 %vm2580_vm10, %v2579_v19 }
 0x8b8   :  { %2199 = vmatpush3.bf16.msra.mxu0 %v2350_v58 }
 0x8b9   :  { %2200 = vmatprep.subr.bf16.mxu0 %v2579_v19 }
 0x8bc   :  { %2201 = vmatpush3.bf16.msra.mxu0 %v2351_v34 }
 0x8bd   :  { %2202 = vmatprep.subr.bf16.mxu0 %v2579_v19 }
 0x8c0   :  { %2203 = vmatpush3.bf16.msra.mxu0 %v2352_v59 }
 0x8c1   :  { %2204 = vmatprep.subr.bf16.mxu0 %v2579_v19 }
 0x8c4   :  { %2205 = vmatpush3.bf16.msra.mxu0 %v2353_v60 }
 0x8c5   :  { %2206 = vmatprep.subr.bf16.mxu0 %v2579_v19 }
 0x8c8   :  { %2207 = vmatpush3.bf16.msra.mxu0 %v2354_v61 }
 0x8c9   :  { %2208 = vmatprep.subr.bf16.mxu0 %v2579_v19 }
 0x8cc   :  { %2209 = vmatpush3.bf16.msra.mxu0 %v2355_v62 }
 0x8cd   :  { %2210 = vmatprep.subr.bf16.mxu0 %v2579_v19 }
 0x8d0   :  { %2211 = vmatpush3.bf16.msra.mxu0 %v2356_v63 }
 0x8d1   :  { %2244 = vmatprep.subr.bf16.mxu0 %v2579_v19 }
 0x986   :  { %v1501_v1 = vpop.f32.mrb[32].mxu0  ;;  %v1542_v2 = vpop.f32.mrb[32].mxu1 }
 0x987   :  { %v1553_v49 = vrot.slane %v1501_v1, 2  ;;  %v1503_v50 = vpop.f32.mrb[33].mxu0  ;;  %v1544_v3 = vpop.f32.mrb[33].mxu1  ;;  %v1555_v17 = vrot.slane %v1542_v2, 2 }
 0x988   :  { %v1554_v4 = vrot.slane %v1503_v50, 2  ;;  %v1505_v5 = vpop.f32.mrb[34].mxu0  ;;  %v1546_v6 = vpop.f32.mrb[34].mxu1  ;;  %v1556_v12 = vrot.slane %v1544_v3, 2 }
 0x989   :  { %v1561_v7 = vadd.f32 %v1553_v49, %v2865_v42  ;;  %v1506_v8 = vpop.f32.mrb[35].mxu0  ;;  %v1547_v9 = vpop.f32.mrb[35].mxu1  ;;  %v1563_v18 = vadd.f32 %v1555_v17, %v2874_v23 }
 0x98a   :  { %v1562_v10 = vadd.f32 %v1554_v4, %v2868_v45  ;;  %v1564_v16 = vadd.f32 %v1556_v12, %v2876_v25  ;;  %v2357_v9 = vld [vmem:[%s3304_s9] sm:$0xff]  }
 0x98b   :  { %v2124_v11 = vmul.f32 -1.442695, %v1561_v7  ;;  %v2581_v7 = vmov 65535   ;;  %2217 = vmatpush3.bf16.msra.mxu1 %v2357_v9 }
 0x98c   :  { %v2125_v15 = vmul.f32 -1.442695, %v1562_v10  ;;  %v2126_v14 = vmul.f32 -1.442695, %v1564_v16  ;;  %v1808_v8 = vsel %vm127_vm0, 4294967295, %v2581_v7  ;;  %2218 = vmatprep.subr.bf16.mxu1 %v2579_v19 }
 0x98d   :  { %2481 = vpow2.f32 %v2124_v11  ;;  %v1809_v10 = vsel %vm1625_vm8, %v1808_v8, 0  ;;  %v2358_v11 = vld [vmem:[%s3304_s9 + $0x8] ss:$0 sps:$4 sm:$0x33]  }
 0x98e   :  { %2483 = vpow2.f32 %v2125_v15  ;;  %v1811_v15 = vand.u32 %v2358_v11, %v1809_v10 }
 0x98f   :  { %2485 = vpow2.f32 %v2126_v14 }
 0x990   :  { %2487 = vtanh.f32 %v1563_v18  ;;  %2219 = vmatpush3.bf16.msra.mxu1 %v1811_v15 }
 0x991   :  { %2224 = vmatprep.subr.bf16.mxu1 %v2579_v19 }
 0x997   :  { %v2482_v29 = vpop.eup %2481 }
 0x998   :  { %v2484_v41 = vpop.eup %2483  ;;  %v1568_v20 = vadd.f32 1.0, %v2482_v29 }
 0x999   :  { %v1574_v42 = vadd.f32 1.0, %v2484_v41  ;;  %v2486_v45 = vpop.eup %2485  ;;  %v2359_v41 = vld [vmem:[%s3303_s8] sm:$0xff]  }
 0x99a   :  { %2489 = vrcp.f32 %v1568_v20  ;;  %v2488_v46 = vpop.eup %2487  ;;  %v1581_v25 = vadd.f32 1.0, %v2486_v45  ;;  %v2361_v45 = vld [vmem:[%s3303_s8 + $0x10] sm:$0xff]  }
 0x99b   :  { %2491 = vrcp.f32 %v1574_v42  ;;  %v2360_v42 = vld [vmem:[%s3303_s8 + $0x8] sm:$0xff]  }
 0x99c   :  { %2493 = vrcp.f32 %v1581_v25  ;;  %v2367_v25 = vld [vmem:[%s3306_s11] sm:$0xff]  }
 0x9a4   :  { %v2490_v21 = vpop.eup %2489 }
 0x9a5   :  { %v2492_v48 = vpop.eup %2491  ;;  %v1588_v40 = vmul.f32 %v2490_v21, %v2488_v46  ;;  %v2362_v46 = vld [vmem:[%s3303_s8 + $0x18] sm:$0xff]   ;;  %v2363_v21 = vld [vmem:[%s3303_s8 + $0x20] sm:$0xff]  }
 0x9a6   :  { %v1587_v31 = vmul.f32 %v2492_v48, %v1585_v37  ;;  %v2494_v23 = vpop.eup %2493  ;;  %v2364_v37 = vld [vmem:[%s3303_s8 + $0x28] sm:$0xff]   ;;  %v2365_v48 = vld [vmem:[%s3303_s8 + $0x30] sm:$0xff]  }
 0x9a8   :  { %v1589_v26 = vadd.f32 %v1588_v40, %v1587_v31  ;;  %v2366_v40 = vld [vmem:[%s3303_s8 + $0x38] sm:$0xff]   ;;  %v2368_v31 = vld [vmem:[%s3306_s11 + $0x8] sm:$0xff]  }
 0x9aa   :  { %2495 = vtanh.f32 %v1589_v26 }
 0x9b4   :  { %v2496_v36 = vpop.eup %2495 }
 0x9b5   :  { %v1591_v22 = vmul.f32 %v2496_v36, %v2494_v23 }
 0x9b7   :  { %v1593_v47 = vrot.slane %v1591_v22, 6  ;;  %v1624_v38 = vsel %vm1595_vm7, %v1591_v22, %v1622_v32  ;;  %v2149_v32 = vld [vmem:[%s3305_s10] ss:$0 sm:$0xff] }
 0x9b8   :  { %v1633_v51 = vsel %vm1629_vm11, %v3151_v56, %v1624_v38 }
 0x9b9   :  { %v1596_v52 = vsel %vm1595_vm7, %v2883_v43, %v1593_v47  ;;  %v1635_v0 = vmax.f32 %v1633_v51, 0.0  ;;  %v2127_v43 = vld [vmem:[%s3302_s7] ss:$0 sm:$0xff]  ;;  %s2582_s7 = smov [#allocation5]  }
 0x9ba   :  { %v1626_v55 = vsel %vm1625_vm8, %v1596_v52, %v1600_v53  ;;  %s2029_s25 = sshll.u32 %s2582_s7, 4  ;;  %s2030_s25 = int_to_ptr.vmem [resolvable:$true] %s2029_s25 }
 0x9bb   :  { %v1628_v39 = vsel %vm1627_vm9, %v1626_v55, %v1604_v54  ;;  %s2549_s10 = scalar_lea.vmem %s2030_s25, 256  ;;  %p2554_p9 = scmp.lt.s32.totalorder %s2030_s25, %s2030_s25 }
 0x9bc   :  { %v1630_v28 = vsel %vm1629_vm11, %v1628_v39, %v1608_v24  ;;  %v2150_v24 = vld [vmem:[%s3307_s12] ss:$0 sm:$0xff]  ;;  %p2550_p8 = scmp.ne.s32.totalorder %s2030_s25, %s2549_s10  ;;  %p2555_p10 = scmp.lt.s32.totalorder %s2549_s10, %s2549_s10 }
 0x9bd   :  { %v1634_v57 = vmax.f32 %v1630_v28, 0.0 }
 0x9be   :  { %p2556_p11 = por %p2555_p10, %p2554_p9 }
 0x9bf   :  { %v3210_v56 = vpack.c.bf16 %v1635_v0, %v1634_v57 }
 0x9c0   :  { %p2557_p12 = pnand %p2556_p11, %p2550_p8 }
 0x9c1   :  { %2213 = vmatmul.mubr.bf16.vlgmr.msra.gmra.mrb[36].mxu0 %v3210_v56 }
 0x9c2   :  { %2248 = vmatprep.mubr.msk.bf16.mxu0 %vm2580_vm10, %v2579_v19  ;;  %2245 = vmatpush3.bf16.msra.mxu0 %v2367_v25 }
 0x9c3   :  { %2246 = vmatprep.subr.bf16.mxu0 %v2579_v19 }
 0x9c6   :  { %2247 = vmatpush3.bf16.msra.mxu0 %v2368_v31 }
 0xa94   :  { %v1742_v35 = vpop.f32.mrb[36].mxu0 }
 0xa95   :  { %v1743_v33 = vadd.f32 %v2127_v43, %v1742_v35  ;;  %v2214_v30 = vpop.f32.mrb[37].mxu0 }
 0xa96   :  { %v1745_v58 = vpop.f32.mrb[38].mxu0 }
 0xa97   :  { %v1746_v34 = vadd.f32 %v2127_v43, %v1745_v58  ;;  %v2215_v59 = vpop.f32.mrb[39].mxu0  ;;  %v1750_v60 = vsel %vm1749_vm12, %v1743_v33, -inf }
 0xa98   :  { %1751 = vmax.xlane.f32.xlu0 %v1750_v60 }
 0xa99   :  { %v1753_v61 = vsel %vm1749_vm12, %v1746_v34, -inf }
 0xa9a   :  { %1754 = vmax.xlane.f32.xlu1 %v1753_v61 }
 0xb25   :  { %v1752_v62 = vpop.xlane.xlu0 %1751 }
 0xb26   :  { %v1756_v63 = vsub.f32 %v1743_v33, %v1752_v62 }
 0xb27   :  { %v1755_v1 = vpop.xlane.xlu1 %1754 }
 0xb28   :  { %v1758_v2 = vmul.f32 1.442695, %v1756_v63  ;;  %v1757_v49 = vsub.f32 %v1746_v34, %v1755_v1 }
 0xb2a   :  { %2497 = vpow2.f32 %v1758_v2  ;;  %v1760_v50 = vmul.f32 1.442695, %v1757_v49 }
 0xb2c   :  { %2499 = vpow2.f32 %v1760_v50 }
 0xb34   :  { %v2498_v3 = vpop.eup %2497 }
 0xb35   :  { %v1764_v4 = vsel %vm1749_vm12, %v2498_v3, 0.0  ;;  %v1762_v16 = vmul.f32 19.0, %v2498_v3 }
 0xb36   :  { %v2500_v5 = vpop.eup %2499  ;;  %1765 = vadd.xlane.f32.xlu0 %v1764_v4 }
 0xb37   :  { %v1767_v6 = vsel %vm1749_vm12, %v2500_v5, 0.0  ;;  %v1763_v17 = vmul.f32 19.0, %v2500_v5 }
 0xb3a   :  { %1768 = vadd.xlane.f32.xlu0 %v1767_v6 }
 0xbc3   :  { %v1766_v12 = vpop.xlane.xlu0 %1765 }
 0xbc4   :  { %vm1770_vm13 = vcmp.gt.f32.partialorder %v1762_v16, %v1766_v12 }
 0xbc5   :  { %v2136_v18 = vsel %vm1770_vm13, 1.0, %v2579_v19 }
 0xbc7   :  { %v1769_v14 = vpop.xlane.xlu0 %1768 }
 0xbc8   :  { %vm1771_vm14 = vcmp.gt.f32.partialorder %v1763_v17, %v1769_v14 }
 0xbc9   :  { %v2137_v29 = vsel %vm1771_vm14, 1.0, %v2579_v19 }
 0xbca   :  { %v1776_v20 = vpack.c.bf16 %v2137_v29, %v2136_v18 }
 0xbcc   :  { %2221 = vmatmul.mubr.msk.bf16.vlgmr.msra.gmra.mrb[36].mxu1 %vm1749_vm12, %v1776_v20 }
 0xbcd   :  { %2225 = vmatpush3.bf16.msra.mxu1 %v2359_v41  ;;  %2240 = vmatprep.mubr.msk.bf16.mxu1 %vm2580_vm10, %v2579_v19 }
 0xbce   :  { %2226 = vmatprep.subr.bf16.mxu1 %v2579_v19 }
 0xbd1   :  { %2227 = vmatpush3.bf16.msra.mxu1 %v2360_v42 }
 0xbd2   :  { %2228 = vmatprep.subr.bf16.mxu1 %v2579_v19 }
 0xbd5   :  { %2229 = vmatpush3.bf16.msra.mxu1 %v2361_v45 }
 0xbd6   :  { %2230 = vmatprep.subr.bf16.mxu1 %v2579_v19 }
 0xbd9   :  { %2231 = vmatpush3.bf16.msra.mxu1 %v2362_v46 }
 0xbda   :  { %2232 = vmatprep.subr.bf16.mxu1 %v2579_v19 }
 0xbdd   :  { %2233 = vmatpush3.bf16.msra.mxu1 %v2363_v21 }
 0xbde   :  { %2234 = vmatprep.subr.bf16.mxu1 %v2579_v19 }
 0xbe1   :  { %2235 = vmatpush3.bf16.msra.mxu1 %v2364_v37 }
 0xbe2   :  { %2236 = vmatprep.subr.bf16.mxu1 %v2579_v19 }
 0xbe5   :  { %2237 = vmatpush3.bf16.msra.mxu1 %v2365_v48 }
 0xbe6   :  { %2238 = vmatprep.subr.bf16.mxu1 %v2579_v19 }
 0xbe9   :  { %2239 = vmatpush3.bf16.msra.mxu1 %v2366_v40 }
 0xbec   :  { %2241 = vmatmul.mubr.bf16.vlgmr.msra.gmra.mrb[40].mxu1 %v3210_v56 }
 0xc9f   :  { %v1847_v26 = vpop.f32.mrb[36].mxu1 }
 0xca0   :  { %v2222_v23 = vpop.f32.mrb[37].mxu1 }
 0xca1   :  { %v1850_v36 = vpop.f32.mrb[38].mxu1 }
 0xca2   :  { %v2223_v44 = vpop.f32.mrb[39].mxu1 }
 0xcbf   :  { %v1936_v22 = vpop.f32.mrb[40].mxu1 }
 0xcc0   :  { %v1937_v27 = vadd.f32 %v1936_v22, %v1847_v26  ;;  %v2242_v47 = vpop.f32.mrb[41].mxu1 }
 0xcc1   :  { %v1939_v13 = vpop.f32.mrb[42].mxu1 }
 0xcc2   :  { %v1950_v38 = vadd.f32 %v2149_v32, %v1937_v27  ;;  %v1940_v51 = vadd.f32 %v1939_v13, %v1850_v36  ;;  %v2243_v19 = vpop.f32.mrb[43].mxu1 }
 0xcc4   :  { %v1951_v52 = vadd.f32 %v2149_v32, %v1940_v51  ;;  %v1952_v53 = vmax.f32 %v1950_v38, 0.0 }
 0xcc6   :  { %v1953_v54 = vmax.f32 %v1951_v52, 0.0 }
 0xcc8   :  { %v1954_v55 = vpack.c.bf16 %v1953_v54, %v1952_v53 }
 0xcca   :  { %2249 = vmatmul.mubr.msk.bf16.vlgmr.msra.gmra.mrb[40].mxu0 %vm242_vm6, %v1954_v55 }
 0xd9d   :  { %v2015_v39 = vpop.f32.mrb[40].mxu0 }
 0xd9e   :  { %v2016_v28 = vadd.f32 %v2150_v24, %v2015_v39  ;;  %v2250_v57 = vpop.f32.mrb[41].mxu0 }
 0xd9f   :  { %v2018_v0 = vpop.f32.mrb[42].mxu0 }
 0xda0   :  { %2022 = vst [vmem:[#allocation5] sm:$0xff] %v2016_v28  ;;  %v2019_v56 = vadd.f32 %v2150_v24, %v2018_v0  ;;  %v2251_v43 = vpop.f32.mrb[43].mxu0 }
 0xda2   :  { %2023 = vst [vmem:[#allocation5 + $0x8] sm:$0xff] %v2019_v56 }
 0xda3   :  { %2560 = shalt.err (!%p2557_p12)
}
 0xda4   :  { %s2561_s28 = scalar_lea.hbm %s3308_s13, 256 }
 0xda5   :  { %p2562_p13 = scmp.ne.s32.totalorder %s3308_s13, %s2561_s28  ;;  %p2565_p0 = scmp.lt.u32.totalorder %s2561_s28, %s3308_s13 }
 0xda7   :  { %p2567_p1 = pnand %p2565_p0, %p2562_p13 }
 0xda9   :  { %2570 = shalt.err (!%p2567_p1)
}
 0xdaa   :  { %s2583_s5 = smov 128   ;;  %s2584_s29 = smov 8  }
 0xdab   :  { %2035 = dma.vmem_to_hbm [thread:$0]  %s2030_s25, 256, %s3308_s13, [#allocation4], %s2583_s5, %s2583_s5, %s2584_s29  }
 0xdac   :  { %2573 = dma.done.wait [#allocation4], 256  }
 0xdad   :  { %2574 = vsyncadd [#allocation4], 4294967040 }
 0xdae   :  { %2039 = vsyncpa [#allocation3], 1 }
 0xdaf   :  { %2040 = vsyncpa [#allocation4], 1 }

</bundles_post_ra>
